<compile_context>
chip_gen: v5e
topology: v5e:2x2
jax: 0.10.0
libtpu: 0.0.40
codegen_flags: <defaults>
</compile_context>

<pallas_src>
import numpy as np
import jax
import jax.numpy as jnp
from jax import lax
from jax.experimental import pallas as pl


# ---------------------------------------------------------------------------
# Trace-time constants: gather indices for the fused conv1/pool1/conv2-im2col
# patch layout.  Row-block index g = (s1*4 + s2)*4 + j2 where
#   s1 = pool1 window (sh1*2+sw1), s2 = pool2 window, j2 = pool2 output pos.
# Each row is the 32x32 input block whose 16 disjoint 8x8 sub-tiles are the
# conv1 receptive fields of the 4x4 conv2 taps for that (s1, s2, j2) combo.
# ---------------------------------------------------------------------------
def _build_patch_indices():
    h0 = np.zeros(64, np.int32)
    w0 = np.zeros(64, np.int32)
    for s1 in range(4):
        s1h, s1w = divmod(s1, 2)
        for s2 in range(4):
            s2h, s2w = divmod(s2, 2)
            for j2 in range(4):
                p2h, p2w = divmod(j2, 2)
                g = (s1 * 4 + s2) * 4 + j2
                h0[g] = 32 * p2h + 16 * s2h + 4 * s1h
                w0[g] = 32 * p2w + 16 * s2w + 4 * s1w
    lh = np.arange(32)
    flat = ((h0[:, None, None] + lh[None, :, None]) * 84
            + (w0[:, None, None] + lh[None, None, :]))
    return flat.reshape(64, 32 * 32).astype(np.int32)


_PATCH_IDX = _build_patch_indices()            # (64, 1024), values < 84*84


# ---------------------------------------------------------------------------
# The single fused Pallas kernel
# ---------------------------------------------------------------------------
def _full_spec(shape):
    # single-block BlockSpec: block == whole array, no grid
    return pl.BlockSpec(shape, lambda: (0,) * len(shape))


def _dqnet_kernel(p_ref, w1_ref, b1_ref, w2_ref, b2_ref,
                  wf1_ref, bf1_ref, wf2_ref, bf2_ref, out_ref):
    """Entire DQNet forward, VMEM-resident, 7 MXU matmuls total.

    p_ref  : (64*B, 1024) bf16  input patches, rows = (s1, s2, j2, b),
                                cols = flattened 32x32 input block.
    w1_ref : (1024, 256)  bf16  block-diagonal expanded conv1 weight; output
                                cols = (conv2 tap kh*4+kw, conv1 channel).
    b1_ref : (1, 256)     f32   conv1 bias tiled over the 16 conv2 taps.
    w2_ref : (256, 32)    bf16  conv2 weight as one im2col matrix.
    wf1_ref: (4, 32, 256) bf16  fc1 weight split per pool2 spatial tap j2
                                (torch NCHW flatten folded in).
    wf2_ref: (256, 2)     bf16  fc2 weight.
    out_ref: (B, 2)       f32   softmax action probabilities.
    """
    B = out_ref.shape[0]
    n1 = 16 * B          # rows after pool1: (s2, j2, b)
    n2 = 4 * B           # rows after pool2: (j2, b)

    # ---- conv1 (one lane-dense matmul over all pool-window copies) ---------
    y1 = jnp.dot(p_ref[...], w1_ref[...],
                 preferred_element_type=jnp.float32)          # (64B, 256)

    # ---- pool1: max over the 4 contiguous s1 row blocks; bias + ReLU -------
    # (bias is window-invariant and relu is monotone => commutes with max)
    m1 = jnp.maximum(jnp.maximum(y1[0:n1], y1[n1:2 * n1]),
                     jnp.maximum(y1[2 * n1:3 * n1], y1[3 * n1:4 * n1]))
    x1 = jnp.maximum(m1 + b1_ref[...], 0.0)                   # (16B, 256)

    # ---- conv2: ONE matmul, K=256, N=32 (rows already im2col-ordered) ------
    y2 = jnp.dot(x1.astype(jnp.bfloat16), w2_ref[...],
                 preferred_element_type=jnp.float32)          # (16B, 32)

    # ---- pool2: max over the 4 contiguous s2 row blocks; bias + ReLU -------
    m2 = jnp.maximum(jnp.maximum(y2[0:n2], y2[n2:2 * n2]),
                     jnp.maximum(y2[2 * n2:3 * n2], y2[3 * n2:4 * n2]))
    x2 = jnp.maximum(m2 + b2_ref[...], 0.0).astype(jnp.bfloat16)  # (4B, 32)

    # ---- fc1 + ReLU (NCHW flatten folded into 4 per-tap weights) -----------
    # Kept as 4 small lane-dense (B,32)@(32,256) dots accumulated in f32 to
    # avoid an in-kernel (4B,32)->(B,128) sublane->lane relayout.
    h = jnp.dot(x2[0:B], wf1_ref[0], preferred_element_type=jnp.float32)
    for j in range(1, 4):
        h = h + jnp.dot(x2[j * B:(j + 1) * B], wf1_ref[j],
                        preferred_element_type=jnp.float32)
    h = jnp.maximum(h + bf1_ref[...], 0.0)                    # (B, 256)

    # ---- fc2 + exact softmax(dim=1) -----------------------------------------
    logits = jnp.dot(h.astype(jnp.bfloat16), wf2_ref[...],
                     preferred_element_type=jnp.float32) + bf2_ref[...]
    e = jnp.exp(logits - jnp.max(logits, axis=-1, keepdims=True))
    out_ref[...] = e / jnp.sum(e, axis=-1, keepdims=True)


# ---------------------------------------------------------------------------
# One-time weight preparation (numpy, OUTSIDE the per-call jit path)
# ---------------------------------------------------------------------------
def prepare_weights(p):
    cw1 = np.asarray(p["conv1_w"], np.float32)            # (16,1,8,8) OIHW
    blk = np.transpose(cw1[:, 0], (1, 2, 0))               # (dh, dw, c)
    w1big = np.zeros((4, 8, 4, 8, 4, 4, 16), np.float32)   # block-diagonal
    for kh in range(4):
        for kw in range(4):
            w1big[kh, :, kw, :, kh, kw, :] = blk
    w1big = w1big.reshape(1024, 256)

    b1 = np.tile(np.asarray(p["conv1_b"], np.float32), 16).reshape(1, 256)

    cw2 = np.asarray(p["conv2_w"], np.float32)              # (32,16,4,4)
    w2 = np.transpose(cw2, (2, 3, 1, 0)).reshape(256, 32)   # (kh,kw,cin)->cout
    b2 = np.asarray(p["conv2_b"], np.float32).reshape(1, 32)

    f1 = np.asarray(p["fc1_w"], np.float32)                  # (256, 128)
    wf1 = np.transpose(f1.reshape(256, 32, 4), (2, 1, 0))    # (j2, cin, out)
    bf1 = np.asarray(p["fc1_b"], np.float32).reshape(1, 256)

    wf2 = np.asarray(p["fc2_w"], np.float32).T               # (256, 2)
    bf2 = np.asarray(p["fc2_b"], np.float32).reshape(1, 2)

    return {
        "w1": jnp.asarray(w1big, jnp.bfloat16), "b1": jnp.asarray(b1),
        "w2": jnp.asarray(w2, jnp.bfloat16),    "b2": jnp.asarray(b2),
        "wf1": jnp.asarray(wf1, jnp.bfloat16),  "bf1": jnp.asarray(bf1),
        "wf2": jnp.asarray(wf2, jnp.bfloat16),  "bf2": jnp.asarray(bf2),
    }


# ---------------------------------------------------------------------------
# Per-call forward: one XLA gather (im2col) + ONE pallas_call
# ---------------------------------------------------------------------------
@jax.jit
def dqnet_forward(w, state):
    """state: (B, 1, 84, 84) float32 NCHW -> (B, 2) action probabilities."""
    B = state.shape[0]
    img = state.reshape(B, 84 * 84)
    idx = jnp.asarray(_PATCH_IDX.reshape(-1))                 # trace-time const
    p = jnp.take(img, idx, axis=1).reshape(B, 64, 1024)
    p = jnp.transpose(p, (1, 0, 2)).reshape(64 * B, 1024)
    p = p.astype(jnp.bfloat16)                                 # halve input DMA

    args = (p, w["w1"], w["b1"], w["w2"], w["b2"],
            w["wf1"], w["bf1"], w["wf2"], w["bf2"])

    # Single VMEM-resident block; for large-batch inference shard the patch-row
    # dim with a grid + dimension_semantics=("parallel",) (v7x dual TensorCore).
    return pl.pallas_call(
        _dqnet_kernel,
        out_shape=jax.ShapeDtypeStruct((B, 2), jnp.float32),
        in_specs=[_full_spec(a.shape) for a in args],
        out_specs=_full_spec((B, 2)),
    )(*args)


# ---------------------------------------------------------------------------
# Deterministic parameter init (PyTorch-style uniform(-1/sqrt(fan_in), ...))
# ---------------------------------------------------------------------------
def init_params(key):
    ks = jax.random.split(key, 8)

    def u(k, shape, fan_in):
        bound = 1.0 / (fan_in ** 0.5)
        return jax.random.uniform(k, shape, jnp.float32, -bound, bound)

    return {
        "conv1_w": u(ks[0], (16, 1, 8, 8), 1 * 8 * 8),     # OIHW
        "conv1_b": u(ks[1], (16,), 1 * 8 * 8),
        "conv2_w": u(ks[2], (32, 16, 4, 4), 16 * 4 * 4),   # OIHW
        "conv2_b": u(ks[3], (32,), 16 * 4 * 4),
        "fc1_w": u(ks[4], (256, 128), 128),                # (out, in) like torch
        "fc1_b": u(ks[5], (256,), 128),
        "fc2_w": u(ks[6], (2, 256), 256),
        "fc2_b": u(ks[7], (2,), 256),
    }


# ---------------------------------------------------------------------------
# Pure-JAX reference (sanity check)
# ---------------------------------------------------------------------------
def dqnet_reference(p, state):
    hp = lax.Precision.HIGHEST
    y = lax.conv_general_dilated(state, p["conv1_w"], (4, 4), "VALID",
                                 dimension_numbers=("NCHW", "OIHW", "NCHW"),
                                 precision=hp)
    y = jnp.maximum(y + p["conv1_b"][None, :, None, None], 0.0)
    y = lax.reduce_window(y, -jnp.inf, lax.max, (1, 1, 2, 2), (1, 1, 2, 2), "VALID")
    y = lax.conv_general_dilated(y, p["conv2_w"], (2, 2), "VALID",
                                 dimension_numbers=("NCHW", "OIHW", "NCHW"),
                                 precision=hp)
    y = jnp.maximum(y + p["conv2_b"][None, :, None, None], 0.0)
    y = lax.reduce_window(y, -jnp.inf, lax.max, (1, 1, 2, 2), (1, 1, 2, 2), "VALID")
    y = y.reshape(y.shape[0], -1)
    y = jnp.maximum(jnp.dot(y, p["fc1_w"].T, precision=hp) + p["fc1_b"], 0.0)
    logits = jnp.dot(y, p["fc2_w"].T, precision=hp) + p["fc2_b"]
    return jax.nn.softmax(logits, axis=1)


if __name__ == "__main__":
    key = jax.random.PRNGKey(0)
    pkey, xkey = jax.random.split(key)
    params = init_params(pkey)

    # 84x84 is the smallest "DQN-style" input for which the torch forward is
    # shape-consistent with fc1 = Linear(128, 256).
    state = jax.random.normal(xkey, (2, 1, 84, 84), dtype=jnp.float32)

    prepped = prepare_weights(params)          # one-time, outside jit
    q = dqnet_forward(prepped, state)
    q = jax.block_until_ready(q)

    assert q.shape == (2, 2), q.shape
    ref = dqnet_reference(params, state)
    # bf16 MXU operands with f32 accumulation; probs at this scale differ from
    # the f32 reference by O(1e-3) — well inside the tolerance.
    assert jnp.allclose(q, ref, atol=2e-2, rtol=2e-2), (q, ref)
    assert jnp.allclose(jnp.sum(q, axis=1), 1.0, atol=1e-3)

    print("KERNEL_OK")
</pallas_src>

<mosaic_0001>
module attributes {stable_mosaic.version = 11 : i64} {
  func.func @_dqnet_kernel(%arg0: memref<128x1024xbf16, #tpu.memory_space<vmem>>, %arg1: memref<1024x256xbf16, #tpu.memory_space<vmem>>, %arg2: memref<1x256xf32, #tpu.memory_space<vmem>>, %arg3: memref<256x32xbf16, #tpu.memory_space<vmem>>, %arg4: memref<1x32xf32, #tpu.memory_space<vmem>>, %arg5: memref<4x32x256xbf16, #tpu.memory_space<vmem>>, %arg6: memref<1x256xf32, #tpu.memory_space<vmem>>, %arg7: memref<256x2xbf16, #tpu.memory_space<vmem>>, %arg8: memref<1x2xf32, #tpu.memory_space<vmem>>, %arg9: memref<2x2xf32, #tpu.memory_space<vmem>>) attributes {dimension_semantics = [], scalar_prefetch = 0 : i64, scratch_operands = 0 : i64, tpu.core_type = #tpu.core_type<tc>} {
    %c0 = arith.constant 0 : index
    %c0_0 = arith.constant 0 : index
    %0 = vector.load %arg0[%c0, %c0_0] : memref<128x1024xbf16, #tpu.memory_space<vmem>>, vector<128x1024xbf16>
    %c0_1 = arith.constant 0 : index
    %c0_2 = arith.constant 0 : index
    %1 = vector.load %arg1[%c0_1, %c0_2] : memref<1024x256xbf16, #tpu.memory_space<vmem>>, vector<1024x256xbf16>
    %cst = arith.constant dense<0.000000e+00> : vector<128x256xf32>
    %2 = tpu.matmul %0, %1, %cst {dimension_numbers = #tpu.dot_dimension_numbers<[1], [0], [0], [1], [0, 0, 1, 1], [], []>} : vector<128x1024xbf16>, vector<1024x256xbf16>, vector<128x256xf32> -> vector<128x256xf32>
    %3 = vector.extract_strided_slice %2 {offsets = [0, 0], sizes = [32, 256], strides = [1, 1]} : vector<128x256xf32> to vector<32x256xf32>
    %4 = vector.extract_strided_slice %2 {offsets = [32, 0], sizes = [32, 256], strides = [1, 1]} : vector<128x256xf32> to vector<32x256xf32>
    %5 = arith.maximumf %3, %4 : vector<32x256xf32>
    %6 = vector.extract_strided_slice %2 {offsets = [64, 0], sizes = [32, 256], strides = [1, 1]} : vector<128x256xf32> to vector<32x256xf32>
    %7 = vector.extract_strided_slice %2 {offsets = [96, 0], sizes = [32, 256], strides = [1, 1]} : vector<128x256xf32> to vector<32x256xf32>
    %8 = arith.maximumf %6, %7 : vector<32x256xf32>
    %9 = arith.maximumf %5, %8 : vector<32x256xf32>
    %c0_3 = arith.constant 0 : index
    %c0_4 = arith.constant 0 : index
    %10 = vector.load %arg2[%c0_3, %c0_4] : memref<1x256xf32, #tpu.memory_space<vmem>>, vector<1x256xf32>
    %11 = vector.broadcast %10 : vector<1x256xf32> to vector<32x256xf32>
    %12 = arith.addf %9, %11 : vector<32x256xf32>
    %cst_5 = arith.constant 0.000000e+00 : f32
    %13 = vector.broadcast %cst_5 : f32 to vector<32x256xf32>
    %14 = arith.maximumf %12, %13 : vector<32x256xf32>
    %15 = arith.truncf %14 : vector<32x256xf32> to vector<32x256xbf16>
    %c0_6 = arith.constant 0 : index
    %c0_7 = arith.constant 0 : index
    %16 = vector.load %arg3[%c0_6, %c0_7] : memref<256x32xbf16, #tpu.memory_space<vmem>>, vector<256x32xbf16>
    %cst_8 = arith.constant dense<0.000000e+00> : vector<32x32xf32>
    %17 = tpu.matmul %15, %16, %cst_8 {dimension_numbers = #tpu.dot_dimension_numbers<[1], [0], [0], [1], [0, 0, 1, 1], [], []>} : vector<32x256xbf16>, vector<256x32xbf16>, vector<32x32xf32> -> vector<32x32xf32>
    %18 = vector.extract_strided_slice %17 {offsets = [0, 0], sizes = [8, 32], strides = [1, 1]} : vector<32x32xf32> to vector<8x32xf32>
    %19 = vector.extract_strided_slice %17 {offsets = [8, 0], sizes = [8, 32], strides = [1, 1]} : vector<32x32xf32> to vector<8x32xf32>
    %20 = arith.maximumf %18, %19 : vector<8x32xf32>
    %21 = vector.extract_strided_slice %17 {offsets = [16, 0], sizes = [8, 32], strides = [1, 1]} : vector<32x32xf32> to vector<8x32xf32>
    %22 = vector.extract_strided_slice %17 {offsets = [24, 0], sizes = [8, 32], strides = [1, 1]} : vector<32x32xf32> to vector<8x32xf32>
    %23 = arith.maximumf %21, %22 : vector<8x32xf32>
    %24 = arith.maximumf %20, %23 : vector<8x32xf32>
    %c0_9 = arith.constant 0 : index
    %c0_10 = arith.constant 0 : index
    %25 = vector.load %arg4[%c0_9, %c0_10] : memref<1x32xf32, #tpu.memory_space<vmem>>, vector<1x32xf32>
    %26 = vector.broadcast %25 : vector<1x32xf32> to vector<8x32xf32>
    %27 = arith.addf %24, %26 : vector<8x32xf32>
    %cst_11 = arith.constant 0.000000e+00 : f32
    %28 = vector.broadcast %cst_11 : f32 to vector<8x32xf32>
    %29 = arith.maximumf %27, %28 : vector<8x32xf32>
    %30 = arith.truncf %29 : vector<8x32xf32> to vector<8x32xbf16>
    %31 = vector.extract_strided_slice %30 {offsets = [0, 0], sizes = [2, 32], strides = [1, 1]} : vector<8x32xbf16> to vector<2x32xbf16>
    %c0_12 = arith.constant 0 : index
    %c0_13 = arith.constant 0 : index
    %c0_14 = arith.constant 0 : index
    %32 = vector.load %arg5[%c0_12, %c0_13, %c0_14] : memref<4x32x256xbf16, #tpu.memory_space<vmem>>, vector<1x32x256xbf16>
    %33 = vector.shape_cast %32 : vector<1x32x256xbf16> to vector<32x256xbf16>
    %cst_15 = arith.constant dense<0.000000e+00> : vector<2x256xf32>
    %34 = tpu.matmul %31, %33, %cst_15 {dimension_numbers = #tpu.dot_dimension_numbers<[1], [0], [0], [1], [0, 0, 1, 1], [], []>} : vector<2x32xbf16>, vector<32x256xbf16>, vector<2x256xf32> -> vector<2x256xf32>
    %35 = vector.extract_strided_slice %30 {offsets = [2, 0], sizes = [2, 32], strides = [1, 1]} : vector<8x32xbf16> to vector<2x32xbf16>
    %c1 = arith.constant 1 : index
    %c0_16 = arith.constant 0 : index
    %c0_17 = arith.constant 0 : index
    %36 = vector.load %arg5[%c1, %c0_16, %c0_17] : memref<4x32x256xbf16, #tpu.memory_space<vmem>>, vector<1x32x256xbf16>
    %37 = vector.shape_cast %36 : vector<1x32x256xbf16> to vector<32x256xbf16>
    %cst_18 = arith.constant dense<0.000000e+00> : vector<2x256xf32>
    %38 = tpu.matmul %35, %37, %cst_18 {dimension_numbers = #tpu.dot_dimension_numbers<[1], [0], [0], [1], [0, 0, 1, 1], [], []>} : vector<2x32xbf16>, vector<32x256xbf16>, vector<2x256xf32> -> vector<2x256xf32>
    %39 = arith.addf %34, %38 : vector<2x256xf32>
    %40 = vector.extract_strided_slice %30 {offsets = [4, 0], sizes = [2, 32], strides = [1, 1]} : vector<8x32xbf16> to vector<2x32xbf16>
    %c2 = arith.constant 2 : index
    %c0_19 = arith.constant 0 : index
    %c0_20 = arith.constant 0 : index
    %41 = vector.load %arg5[%c2, %c0_19, %c0_20] : memref<4x32x256xbf16, #tpu.memory_space<vmem>>, vector<1x32x256xbf16>
    %42 = vector.shape_cast %41 : vector<1x32x256xbf16> to vector<32x256xbf16>
    %cst_21 = arith.constant dense<0.000000e+00> : vector<2x256xf32>
    %43 = tpu.matmul %40, %42, %cst_21 {dimension_numbers = #tpu.dot_dimension_numbers<[1], [0], [0], [1], [0, 0, 1, 1], [], []>} : vector<2x32xbf16>, vector<32x256xbf16>, vector<2x256xf32> -> vector<2x256xf32>
    %44 = arith.addf %39, %43 : vector<2x256xf32>
    %45 = vector.extract_strided_slice %30 {offsets = [6, 0], sizes = [2, 32], strides = [1, 1]} : vector<8x32xbf16> to vector<2x32xbf16>
    %c3 = arith.constant 3 : index
    %c0_22 = arith.constant 0 : index
    %c0_23 = arith.constant 0 : index
    %46 = vector.load %arg5[%c3, %c0_22, %c0_23] : memref<4x32x256xbf16, #tpu.memory_space<vmem>>, vector<1x32x256xbf16>
    %47 = vector.shape_cast %46 : vector<1x32x256xbf16> to vector<32x256xbf16>
    %cst_24 = arith.constant dense<0.000000e+00> : vector<2x256xf32>
    %48 = tpu.matmul %45, %47, %cst_24 {dimension_numbers = #tpu.dot_dimension_numbers<[1], [0], [0], [1], [0, 0, 1, 1], [], []>} : vector<2x32xbf16>, vector<32x256xbf16>, vector<2x256xf32> -> vector<2x256xf32>
    %49 = arith.addf %44, %48 : vector<2x256xf32>
    %c0_25 = arith.constant 0 : index
    %c0_26 = arith.constant 0 : index
    %50 = vector.load %arg6[%c0_25, %c0_26] : memref<1x256xf32, #tpu.memory_space<vmem>>, vector<1x256xf32>
    %51 = vector.broadcast %50 : vector<1x256xf32> to vector<2x256xf32>
    %52 = arith.addf %49, %51 : vector<2x256xf32>
    %cst_27 = arith.constant 0.000000e+00 : f32
    %53 = vector.broadcast %cst_27 : f32 to vector<2x256xf32>
    %54 = arith.maximumf %52, %53 : vector<2x256xf32>
    %55 = arith.truncf %54 : vector<2x256xf32> to vector<2x256xbf16>
    %c0_28 = arith.constant 0 : index
    %c0_29 = arith.constant 0 : index
    %56 = vector.load %arg7[%c0_28, %c0_29] : memref<256x2xbf16, #tpu.memory_space<vmem>>, vector<256x2xbf16>
    %cst_30 = arith.constant dense<0.000000e+00> : vector<2x2xf32>
    %57 = tpu.matmul %55, %56, %cst_30 {dimension_numbers = #tpu.dot_dimension_numbers<[1], [0], [0], [1], [0, 0, 1, 1], [], []>} : vector<2x256xbf16>, vector<256x2xbf16>, vector<2x2xf32> -> vector<2x2xf32>
    %c0_31 = arith.constant 0 : index
    %c0_32 = arith.constant 0 : index
    %58 = vector.load %arg8[%c0_31, %c0_32] : memref<1x2xf32, #tpu.memory_space<vmem>>, vector<1x2xf32>
    %59 = vector.broadcast %58 : vector<1x2xf32> to vector<2x2xf32>
    %60 = arith.addf %57, %59 : vector<2x2xf32>
    %cst_33 = arith.constant dense<0xFF800000> : vector<2xf32>
    %61 = vector.multi_reduction <maximumf>, %60, %cst_33 [1] : vector<2x2xf32> to vector<2xf32>
    %62 = vector.shape_cast %61 : vector<2xf32> to vector<2x1xf32>
    %63 = vector.broadcast %62 : vector<2x1xf32> to vector<2x2xf32>
    %64 = arith.subf %60, %63 : vector<2x2xf32>
    %65 = math.exp %64 : vector<2x2xf32>
    %cst_34 = arith.constant dense<0.000000e+00> : vector<2xf32>
    %66 = vector.multi_reduction <add>, %65, %cst_34 [1] : vector<2x2xf32> to vector<2xf32>
    %67 = vector.shape_cast %66 : vector<2xf32> to vector<2x1xf32>
    %68 = vector.broadcast %67 : vector<2x1xf32> to vector<2x2xf32>
    %69 = arith.divf %65, %68 : vector<2x2xf32>
    %c0_35 = arith.constant 0 : index
    %c0_36 = arith.constant 0 : index
    %70 = vector.load %arg9[%c0_35, %c0_36] : memref<2x2xf32, #tpu.memory_space<vmem>>, vector<2x2xf32>
    tpu.vector_store %arg9[%c0_35, %c0_36], %69 {strides = array<i32>} : memref<2x2xf32, #tpu.memory_space<vmem>>, vector<2x2xf32>,
    return
  }
}

</mosaic_0001>

<bundles_post_ra>
// kernel: dqnet_forward.1
= control target key start
LH: loop header
LB: loop body
LE: loop exit
PB: predicated region body
PF: predicated region fallthrough
CT: control target
= control target key end

     0   :  { %s5803_s0 = inlined_call_operand.vmem [shape: bf16[128,1024], index: 0, kind: input, shape index: {}]   ;;  %s5804_s1 = inlined_call_operand.vmem [shape: bf16[1024,256], index: 1, kind: input, shape index: {}]   ;;  %s5805_s2 = inlined_call_operand.vmem [shape: f32[1,256], index: 2, kind: input, shape index: {}]   ;;  %s5806_s3 = inlined_call_operand.vmem [shape: bf16[256,32], index: 3, kind: input, shape index: {}]   ;;  %s5807_s4 = inlined_call_operand.vmem [shape: f32[1,32], index: 4, kind: input, shape index: {}]   ;;  %s5808_s5 = inlined_call_operand.vmem [shape: bf16[4,32,256], index: 5, kind: input, shape index: {}]   ;;  %s5809_s6 = inlined_call_operand.vmem [shape: f32[1,256], index: 6, kind: input, shape index: {}]   ;;  %s5810_s7 = inlined_call_operand.vmem [shape: bf16[256,2], index: 7, kind: input, shape index: {}]   ;;  %s5811_s8 = inlined_call_operand.vmem [shape: f32[1,2], index: 8, kind: input, shape index: {}]   ;;  %s5812_s9 = inlined_call_operand.hbm [shape: f32[2,2], index: 9, kind: output, shape index: {}]  }
   0x1   :  { %v2948_v0 = vld [vmem:[%s5804_s1 + $0x70] sm:$0xf]  ;;  %v3693_v1 = vld [vmem:[%s5804_s1 + $0x74] sm:$0xf0]  ;;  %v2940_v11 = vld [vmem:[%s5804_s1 + $0x60] sm:$0xf] }
   0x2   :  { %v3012_v2 = vld [vmem:[%s5804_s1 + $0xf0] sm:$0xf]  ;;  %v2949_v3 = vor.u32 %v3693_v1, %v2948_v0  ;;  %v3709_v4 = vld [vmem:[%s5804_s1 + $0xf4] sm:$0xf0]  ;;  %v3691_v13 = vld [vmem:[%s5804_s1 + $0x64] sm:$0xf0] }
   0x3   :  { %v3076_v5 = vld [vmem:[%s5804_s1 + $0x170] sm:$0xf]  ;;  %v3725_v6 = vld [vmem:[%s5804_s1 + $0x174] sm:$0xf0]  ;;  %v3013_v7 = vor.u32 %v3709_v4, %v3012_v2  ;;  %v3004_v14 = vld [vmem:[%s5804_s1 + $0xe0] sm:$0xf]  ;;  %v2941_v16 = vor.u32 %v3691_v13, %v2940_v11 }
   0x4   :  { %v3077_v8 = vor.u32 %v3725_v6, %v3076_v5  ;;  %v3140_v9 = vld [vmem:[%s5804_s1 + $0x1f0] sm:$0xf]  ;;  %v3741_v10 = vld [vmem:[%s5804_s1 + $0x1f4] sm:$0xf0]  ;;  %1186 = vmatpush.bf16.msra.mxu0 %v2949_v3  ;;  %v3707_v15 = vld [vmem:[%s5804_s1 + $0xe4] sm:$0xf0] }
   0x5   :  { %v3141_v12 = vor.u32 %v3741_v10, %v3140_v9  ;;  %1235 = vmatpush.bf16.msra.mxu1 %v3013_v7  ;;  %v3005_v17 = vor.u32 %v3707_v15, %v3004_v14  ;;  %v3068_v18 = vld [vmem:[%s5804_s1 + $0x160] sm:$0xf]  ;;  %v3723_v19 = vld [vmem:[%s5804_s1 + $0x164] sm:$0xf0]  ;;  %v2932_v23 = vld [vmem:[%s5804_s1 + $0x50] sm:$0xf] }
   0x6   :  { %1284 = vmatpush.bf16.msra.mxu2 %v3077_v8  ;;  %v3132_v20 = vld [vmem:[%s5804_s1 + $0x1e0] sm:$0xf]  ;;  %v3069_v21 = vor.u32 %v3723_v19, %v3068_v18  ;;  %v3739_v22 = vld [vmem:[%s5804_s1 + $0x1e4] sm:$0xf0]  ;;  %v3689_v24 = vld [vmem:[%s5804_s1 + $0x54] sm:$0xf0] }
   0x7   :  { %1333 = vmatpush.bf16.msra.mxu3 %v3141_v12  ;;  %v3133_v25 = vor.u32 %v3739_v22, %v3132_v20  ;;  %v2996_v26 = vld [vmem:[%s5804_s1 + $0xd0] sm:$0xf]  ;;  %v3705_v27 = vld [vmem:[%s5804_s1 + $0xd4] sm:$0xf0]  ;;  %v2933_v29 = vor.u32 %v3689_v24, %v2932_v23  ;;  %v2924_v35 = vld [vmem:[%s5804_s1 + $0x40] sm:$0xf] }
   0x8   :  { %v3060_v28 = vld [vmem:[%s5804_s1 + $0x150] sm:$0xf]  ;;  %1187 = vmatpush.bf16.msra.mxu0 %v2941_v16  ;;  %v3721_v30 = vld [vmem:[%s5804_s1 + $0x154] sm:$0xf0]  ;;  %v2997_v33 = vor.u32 %v3705_v27, %v2996_v26  ;;  %v3687_v36 = vld [vmem:[%s5804_s1 + $0x44] sm:$0xf0] }
   0x9   :  { %v3124_v31 = vld [vmem:[%s5804_s1 + $0x1d0] sm:$0xf]  ;;  %v3737_v32 = vld [vmem:[%s5804_s1 + $0x1d4] sm:$0xf0]  ;;  %1236 = vmatpush.bf16.msra.mxu1 %v3005_v17  ;;  %v3061_v34 = vor.u32 %v3721_v30, %v3060_v28  ;;  %v2988_v37 = vld [vmem:[%s5804_s1 + $0xc0] sm:$0xf]  ;;  %v2925_v44 = vor.u32 %v3687_v36, %v2924_v35 }
   0xa   :  { %1285 = vmatpush.bf16.msra.mxu2 %v3069_v21  ;;  %v3125_v38 = vor.u32 %v3737_v32, %v3124_v31  ;;  %v3703_v39 = vld [vmem:[%s5804_s1 + $0xc4] sm:$0xf0]  ;;  %v3052_v40 = vld [vmem:[%s5804_s1 + $0x140] sm:$0xf]  ;;  %v2916_v47 = vld [vmem:[%s5804_s1 + $0x30] sm:$0xf] }
   0xb   :  { %1334 = vmatpush.bf16.msra.mxu3 %v3133_v25  ;;  %v3719_v41 = vld [vmem:[%s5804_s1 + $0x144] sm:$0xf0]  ;;  %v3116_v42 = vld [vmem:[%s5804_s1 + $0x1c0] sm:$0xf]  ;;  %v2989_v45 = vor.u32 %v3703_v39, %v2988_v37  ;;  %v3685_v48 = vld [vmem:[%s5804_s1 + $0x34] sm:$0xf0] }
   0xc   :  { %v3735_v43 = vld [vmem:[%s5804_s1 + $0x1c4] sm:$0xf0]  ;;  %1188 = vmatpush.bf16.msra.mxu0 %v2933_v29  ;;  %v3053_v46 = vor.u32 %v3719_v41, %v3052_v40  ;;  %v2980_v49 = vld [vmem:[%s5804_s1 + $0xb0] sm:$0xf]  ;;  %v3701_v51 = vld [vmem:[%s5804_s1 + $0xb4] sm:$0xf0]  ;;  %v2917_v56 = vor.u32 %v3685_v48, %v2916_v47 }
   0xd   :  { %1237 = vmatpush.bf16.msra.mxu1 %v2997_v33  ;;  %v3117_v50 = vor.u32 %v3735_v43, %v3116_v42  ;;  %v3044_v52 = vld [vmem:[%s5804_s1 + $0x130] sm:$0xf]  ;;  %v3717_v53 = vld [vmem:[%s5804_s1 + $0x134] sm:$0xf0]  ;;  %v2981_v57 = vor.u32 %v3701_v51, %v2980_v49  ;;  %v2908_v59 = vld [vmem:[%s5804_s1 + $0x20] sm:$0xf] }
   0xe   :  { %1286 = vmatpush.bf16.msra.mxu2 %v3061_v34  ;;  %v3108_v54 = vld [vmem:[%s5804_s1 + $0x1b0] sm:$0xf]  ;;  %v3733_v55 = vld [vmem:[%s5804_s1 + $0x1b4] sm:$0xf0]  ;;  %v3045_v58 = vor.u32 %v3717_v53, %v3044_v52  ;;  %v3683_v60 = vld [vmem:[%s5804_s1 + $0x24] sm:$0xf0] }
   0xf   :  { %1335 = vmatpush.bf16.msra.mxu3 %v3125_v38  ;;  %v2972_v61 = vld [vmem:[%s5804_s1 + $0xa0] sm:$0xf]  ;;  %v3109_v62 = vor.u32 %v3733_v55, %v3108_v54  ;;  %v3699_v63 = vld [vmem:[%s5804_s1 + $0xa4] sm:$0xf0]  ;;  %v2909_v4 = vor.u32 %v3683_v60, %v2908_v59  ;;  %v2900_v7 = vld [vmem:[%s5804_s1 + $0x10] sm:$0xf] }
  0x10   :  { %1189 = vmatpush.bf16.msra.mxu0 %v2925_v44  ;;  %v3036_v0 = vld [vmem:[%s5804_s1 + $0x120] sm:$0xf]  ;;  %v3715_v1 = vld [vmem:[%s5804_s1 + $0x124] sm:$0xf0]  ;;  %v2973_v5 = vor.u32 %v3699_v63, %v2972_v61  ;;  %v3681_v8 = vld [vmem:[%s5804_s1 + $0x14] sm:$0xf0] }
  0x11   :  { %1238 = vmatpush.bf16.msra.mxu1 %v2989_v45  ;;  %v3100_v2 = vld [vmem:[%s5804_s1 + $0x1a0] sm:$0xf]  ;;  %v3731_v3 = vld [vmem:[%s5804_s1 + $0x1a4] sm:$0xf0]  ;;  %v3037_v6 = vor.u32 %v3715_v1, %v3036_v0  ;;  %v2964_v9 = vld [vmem:[%s5804_s1 + $0x90] sm:$0xf]  ;;  %v2901_v17 = vor.u32 %v3681_v8, %v2900_v7 }
  0x12   :  { %1287 = vmatpush.bf16.msra.mxu2 %v3053_v46  ;;  %v3101_v10 = vor.u32 %v3731_v3, %v3100_v2  ;;  %v3697_v11 = vld [vmem:[%s5804_s1 + $0x94] sm:$0xf0]  ;;  %v3028_v12 = vld [vmem:[%s5804_s1 + $0x110] sm:$0xf]  ;;  %v2892_v16 = vld [vmem:[%s5804_s1] sm:$0xf] }
  0x13   :  { %1336 = vmatpush.bf16.msra.mxu3 %v3117_v50  ;;  %v3713_v13 = vld [vmem:[%s5804_s1 + $0x114] sm:$0xf0]  ;;  %v3092_v14 = vld [vmem:[%s5804_s1 + $0x190] sm:$0xf]  ;;  %v3679_v18 = vld [vmem:[%s5804_s1 + $0x4] sm:$0xf0]  ;;  %v2965_v21 = vor.u32 %v3697_v11, %v2964_v9 }
  0x14   :  { %1190 = vmatpush.bf16.msra.mxu0 %v2917_v56  ;;  %v3729_v15 = vld [vmem:[%s5804_s1 + $0x194] sm:$0xf0]  ;;  %v2956_v19 = vld [vmem:[%s5804_s1 + $0x80] sm:$0xf]  ;;  %v3695_v20 = vld [vmem:[%s5804_s1 + $0x84] sm:$0xf0]  ;;  %v3029_v22 = vor.u32 %v3713_v13, %v3028_v12  ;;  %v2893_v34 = vor.u32 %v3679_v18, %v2892_v16 }
  0x15   :  { %1239 = vmatpush.bf16.msra.mxu1 %v2981_v57  ;;  %v3020_v23 = vld [vmem:[%s5804_s1 + $0x100] sm:$0xf]  ;;  %v3711_v24 = vld [vmem:[%s5804_s1 + $0x104] sm:$0xf0]  ;;  %v3093_v26 = vor.u32 %v3729_v15, %v3092_v14  ;;  %v3614_v30 = vld [vmem:[%s5803_s0 + $0x4] sm:$0xf]  ;;  %v2957_v38 = vor.u32 %v3695_v20, %v2956_v19 }
  0x16   :  { %1288 = vmatpush.bf16.msra.mxu2 %v3045_v58  ;;  %v3084_v25 = vld [vmem:[%s5804_s1 + $0x180] sm:$0xf]  ;;  %v3727_v27 = vld [vmem:[%s5804_s1 + $0x184] sm:$0xf0]  ;;  %v2638_v31 = vld [vmem:[%s5803_s0 + $0x20] sm:$0xf0]  ;;  %v3021_v39 = vor.u32 %v3711_v24, %v3020_v23 }
  0x17   :  { %1337 = vmatpush.bf16.msra.mxu3 %v3109_v62  ;;  %v2636_v28 = vld [vmem:[%s5803_s0] sm:$0xf]  ;;  %v3332_v32 = vld [vmem:[%s5804_s1 + $0x370] sm:$0xf]  ;;  %v3789_v33 = vld [vmem:[%s5804_s1 + $0x374] sm:$0xf0]  ;;  %v3085_v43 = vor.u32 %v3727_v27, %v3084_v25  ;;  %v4202_v53 = vor.u32 %v3614_v30, %v2638_v31 }
  0x18   :  { %1191 = vmatpush.bf16.msra.mxu0 %v2909_v4  ;;  %v3618_v29 = vld [vmem:[%s5803_s0 + $0x1c] sm:$0xf0]  ;;  %v2644_v35 = vld [vmem:[%s5803_s0 + $0x8] sm:$0xf]  ;;  %v3396_v36 = vld [vmem:[%s5804_s1 + $0x3f0] sm:$0xf]  ;;  %v3333_v44 = vor.u32 %v3789_v33, %v3332_v32 }
  0x19   :  { %1240 = vmatpush.bf16.msra.mxu1 %v2973_v5  ;;  %v3805_v37 = vld [vmem:[%s5804_s1 + $0x3f4] sm:$0xf0]  ;;  %v3619_v40 = vld [vmem:[%s5803_s0 + $0x24] sm:$0xf0]  ;;  %v3615_v41 = vld [vmem:[%s5803_s0 + $0xc] sm:$0xf]  ;;  %v4191_v48 = vor.u32 %v3618_v29, %v2636_v28 }
  0x1a   :  { %1289 = vmatpush.bf16.msra.mxu2 %v3037_v6  ;;  %v2646_v42 = vld [vmem:[%s5803_s0 + $0x28] sm:$0xf0]  ;;  %v3204_v45 = vld [vmem:[%s5804_s1 + $0x270] sm:$0xf]  ;;  %v3757_v46 = vld [vmem:[%s5804_s1 + $0x274] sm:$0xf0]  ;;  %v3397_v49 = vor.u32 %v3805_v37, %v3396_v36  ;;  %v4204_v54 = vor.u32 %v3619_v40, %v2644_v35 }
  0x1b   :  { %1338 = vmatpush.bf16.msra.mxu3 %v3101_v10  ;;  %v3268_v47 = vld [vmem:[%s5804_s1 + $0x2f0] sm:$0xf]  ;;  %v3773_v50 = vld [vmem:[%s5804_s1 + $0x2f4] sm:$0xf0]  ;;  %v3324_v51 = vld [vmem:[%s5804_s1 + $0x360] sm:$0xf]  ;;  %v4212_v57 = vor.u32 %v3615_v41, %v2646_v42  ;;  %v3205_v58 = vor.u32 %v3757_v46, %v3204_v45 }
  0x1c   :  { %1192 = vmatpush.bf16.msra.mxu0 %v2901_v17  ;;  %v3787_v52 = vld [vmem:[%s5804_s1 + $0x364] sm:$0xf0]  ;;  %v3388_v55 = vld [vmem:[%s5804_s1 + $0x3e0] sm:$0xf]  ;;  %v3269_v59 = vor.u32 %v3773_v50, %v3268_v47 }
  0x1d   :  { %1241 = vmatpush.bf16.msra.mxu1 %v2965_v21  ;;  %v3803_v56 = vld [vmem:[%s5804_s1 + $0x3e4] sm:$0xf0]  ;;  %v3325_v60 = vor.u32 %v3787_v52, %v3324_v51  ;;  %v3196_v61 = vld [vmem:[%s5804_s1 + $0x260] sm:$0xf] }
  0x1e   :  { %1290 = vmatpush.bf16.msra.mxu2 %v3029_v22  ;;  %v3755_v62 = vld [vmem:[%s5804_s1 + $0x264] sm:$0xf0]  ;;  %v3389_v63 = vor.u32 %v3803_v56, %v3388_v55  ;;  %v3260_v0 = vld [vmem:[%s5804_s1 + $0x2e0] sm:$0xf] }
  0x1f   :  { %1339 = vmatpush.bf16.msra.mxu3 %v3093_v26  ;;  %v3771_v1 = vld [vmem:[%s5804_s1 + $0x2e4] sm:$0xf0] }
  0x20   :  { %1193 = vmatpush.bf16.msra.mxu0 %v2893_v34 }
  0x21   :  { %1242 = vmatpush.bf16.msra.mxu1 %v2957_v38 }
  0x22   :  { %1291 = vmatpush.bf16.msra.mxu2 %v3021_v39 }
  0x23   :  { %1340 = vmatpush.bf16.msra.mxu3 %v3085_v43  ;;  %1194 = vmatmul.bf16.vlgmr.msra.gmra.mxu0 %v4191_v48 }
  0x24   :  { %1243 = vmatmul.bf16.vlgmr.msra.gmra.mxu1 %v4202_v53 }
  0x25   :  { %1292 = vmatmul.bf16.vlgmr.msra.gmra.mxu2 %v4204_v54 }
  0x26   :  { %1480 = vmatpush.bf16.msrb.mxu2 %v3333_v44 }
  0x27   :  { %1529 = vmatpush.bf16.msrb.mxu3 %v3397_v49 }
  0x28   :  { %14 = vsyncpa [#allocation3], 0  ;;  %1341 = vmatmul.bf16.vlgmr.msra.gmra.mxu3 %v4212_v57  ;;  %1382 = vmatpush.bf16.msrb.mxu0 %v3205_v58  ;;  %v3197_v2 = vor.u32 %v3755_v62, %v3196_v61  ;;  %v3316_v3 = vld [vmem:[%s5804_s1 + $0x350] sm:$0xf]  ;;  %v3785_v4 = vld [vmem:[%s5804_s1 + $0x354] sm:$0xf0]  ;;  %v3261_v6 = vor.u32 %v3771_v1, %v3260_v0 }
  0x29   :  { %v3188_v5 = vld [vmem:[%s5804_s1 + $0x250] sm:$0xf]  ;;  %1431 = vmatpush.bf16.msrb.mxu1 %v3269_v59  ;;  %v3317_v7 = vor.u32 %v3785_v4, %v3316_v3  ;;  %v3753_v8 = vld [vmem:[%s5804_s1 + $0x254] sm:$0xf0]  ;;  %v2668_v16 = vld [vmem:[%s5803_s0 + $0x40] sm:$0xf] }
  0x2a   :  { %1481 = vmatpush.bf16.msrb.mxu2 %v3325_v60  ;;  %v3380_v9 = vld [vmem:[%s5804_s1 + $0x3d0] sm:$0xf]  ;;  %v3801_v10 = vld [vmem:[%s5804_s1 + $0x3d4] sm:$0xf0]  ;;  %v3189_v14 = vor.u32 %v3753_v8, %v3188_v5  ;;  %v3626_v17 = vld [vmem:[%s5803_s0 + $0x5c] sm:$0xf0] }
  0x2b   :  { %1530 = vmatpush.bf16.msrb.mxu3 %v3389_v63  ;;  %v3381_v11 = vor.u32 %v3801_v10, %v3380_v9  ;;  %v3252_v12 = vld [vmem:[%s5804_s1 + $0x2d0] sm:$0xf]  ;;  %v3769_v13 = vld [vmem:[%s5804_s1 + $0x2d4] sm:$0xf0]  ;;  %v3622_v18 = vld [vmem:[%s5803_s0 + $0x44] sm:$0xf]  ;;  %v4278_v24 = vor.u32 %v3626_v17, %v2668_v16 }
  0x2c   :  { %1383 = vmatpush.bf16.msrb.mxu0 %v3197_v2  ;;  %v3253_v15 = vor.u32 %v3769_v13, %v3252_v12  ;;  %v2670_v19 = vld [vmem:[%s5803_s0 + $0x60] sm:$0xf0]  ;;  %v2676_v20 = vld [vmem:[%s5803_s0 + $0x48] sm:$0xf]  ;;  %v3623_v22 = vld [vmem:[%s5803_s0 + $0x4c] sm:$0xf] }
  0x2d   :  { %1432 = vmatpush.bf16.msrb.mxu1 %v3261_v6  ;;  %v3627_v21 = vld [vmem:[%s5803_s0 + $0x64] sm:$0xf0]  ;;  %v2678_v23 = vld [vmem:[%s5803_s0 + $0x68] sm:$0xf0]  ;;  %v4280_v25 = vor.u32 %v3622_v18, %v2670_v19  ;;  %v3308_v28 = vld [vmem:[%s5804_s1 + $0x340] sm:$0xf] }
  0x2e   :  { %1482 = vmatpush.bf16.msrb.mxu2 %v3317_v7  ;;  %v4282_v26 = vor.u32 %v3627_v21, %v2676_v20  ;;  %v4284_v27 = vor.u32 %v3623_v22, %v2678_v23  ;;  %v3783_v29 = vld [vmem:[%s5804_s1 + $0x344] sm:$0xf0]  ;;  %v3180_v30 = vld [vmem:[%s5804_s1 + $0x240] sm:$0xf]  ;;  %v3630_v42 = vld [vmem:[%s5803_s0 + $0x84] sm:$0xf] }
  0x2f   :  { %1531 = vmatpush.bf16.msrb.mxu3 %v3381_v11  ;;  %v3309_v31 = vor.u32 %v3783_v29, %v3308_v28  ;;  %v3751_v32 = vld [vmem:[%s5804_s1 + $0x244] sm:$0xf0]  ;;  %v3372_v33 = vld [vmem:[%s5804_s1 + $0x3c0] sm:$0xf]  ;;  %v2702_v43 = vld [vmem:[%s5803_s0 + $0xa0] sm:$0xf0] }
  0x30   :  { %1384 = vmatpush.bf16.msrb.mxu0 %v3189_v14  ;;  %v3799_v34 = vld [vmem:[%s5804_s1 + $0x3c4] sm:$0xf0]  ;;  %v3181_v35 = vor.u32 %v3751_v32, %v3180_v30  ;;  %v3244_v37 = vld [vmem:[%s5804_s1 + $0x2c0] sm:$0xf]  ;;  %v3631_v46 = vld [vmem:[%s5803_s0 + $0x8c] sm:$0xf]  ;;  %v4340_v50 = vor.u32 %v3630_v42, %v2702_v43 }
  0x31   :  { %1433 = vmatpush.bf16.msrb.mxu1 %v3253_v15  ;;  %v3373_v36 = vor.u32 %v3799_v34, %v3372_v33  ;;  %v3767_v38 = vld [vmem:[%s5804_s1 + $0x2c4] sm:$0xf0]  ;;  %v2700_v40 = vld [vmem:[%s5803_s0 + $0x80] sm:$0xf]  ;;  %v2710_v47 = vld [vmem:[%s5803_s0 + $0xa8] sm:$0xf0] }
  0x32   :  { %1483 = vmatpush.bf16.msrb.mxu2 %v3309_v31  ;;  %v3245_v39 = vor.u32 %v3767_v38, %v3244_v37  ;;  %v3634_v41 = vld [vmem:[%s5803_s0 + $0x9c] sm:$0xf0]  ;;  %v2708_v44 = vld [vmem:[%s5803_s0 + $0x88] sm:$0xf]  ;;  %v4344_v52 = vor.u32 %v3631_v46, %v2710_v47  ;;  %v3300_v55 = vld [vmem:[%s5804_s1 + $0x330] sm:$0xf] }
  0x33   :  { %1199 = vmatmul.bf16.gmra.mxu0 %v4278_v24  ;;  %1532 = vmatpush.bf16.msrb.mxu3 %v3373_v36  ;;  %v3635_v45 = vld [vmem:[%s5803_s0 + $0xa4] sm:$0xf0]  ;;  %v4338_v49 = vor.u32 %v3634_v41, %v2700_v40  ;;  %v3781_v56 = vld [vmem:[%s5804_s1 + $0x334] sm:$0xf0]  ;;  %v3172_v58 = vld [vmem:[%s5804_s1 + $0x230] sm:$0xf] }
  0x34   :  { %1248 = vmatmul.bf16.gmra.mxu1 %v4280_v25  ;;  %1385 = vmatpush.bf16.msrb.mxu0 %v3181_v35  ;;  %v4342_v51 = vor.u32 %v3635_v45, %v2708_v44  ;;  %v3301_v59 = vor.u32 %v3781_v56, %v3300_v55  ;;  %v3749_v60 = vld [vmem:[%s5804_s1 + $0x234] sm:$0xf0]  ;;  %v3364_v61 = vld [vmem:[%s5804_s1 + $0x3b0] sm:$0xf]  ;;  %v2732_v4 = vld [vmem:[%s5803_s0 + $0xc0] sm:$0xf] }
  0x35   :  { %1297 = vmatmul.bf16.gmra.mxu2 %v4282_v26  ;;  %1434 = vmatpush.bf16.msrb.mxu1 %v3245_v39  ;;  %v3797_v62 = vld [vmem:[%s5804_s1 + $0x3b4] sm:$0xf0]  ;;  %v3173_v63 = vor.u32 %v3749_v60, %v3172_v58  ;;  %v3236_v1 = vld [vmem:[%s5804_s1 + $0x2b0] sm:$0xf]  ;;  %v3642_v5 = vld [vmem:[%s5803_s0 + $0xdc] sm:$0xf0] }
  0x36   :  { %v3365_v0 = vor.u32 %v3797_v62, %v3364_v61  ;;  %v3765_v2 = vld [vmem:[%s5804_s1 + $0x2b4] sm:$0xf0]  ;;  %1484 = vmatpush.bf16.msrb.mxu2 %v3301_v59  ;;  %v3638_v6 = vld [vmem:[%s5803_s0 + $0xc4] sm:$0xf]  ;;  %v2740_v8 = vld [vmem:[%s5803_s0 + $0xc8] sm:$0xf]  ;;  %v4398_v12 = vor.u32 %v3642_v5, %v2732_v4 }
  0x37   :  { %v3237_v3 = vor.u32 %v3765_v2, %v3236_v1  ;;  %v2734_v7 = vld [vmem:[%s5803_s0 + $0xe0] sm:$0xf0]  ;;  %v3643_v9 = vld [vmem:[%s5803_s0 + $0xe4] sm:$0xf0]  ;;  %v3639_v10 = vld [vmem:[%s5803_s0 + $0xcc] sm:$0xf] }
  0x38   :  { %1346 = vmatmul.bf16.gmra.mxu3 %v4284_v27  ;;  %1386 = vmatpush.bf16.msrb.mxu0 %v3173_v63  ;;  %v2742_v11 = vld [vmem:[%s5803_s0 + $0xe8] sm:$0xf0]  ;;  %v4400_v13 = vor.u32 %v3638_v6, %v2734_v7  ;;  %v4402_v14 = vor.u32 %v3643_v9, %v2740_v8  ;;  %v3292_v16 = vld [vmem:[%s5804_s1 + $0x320] sm:$0xf]  ;;  %v3779_v17 = vld [vmem:[%s5804_s1 + $0x324] sm:$0xf0] }
  0x39   :  { %1533 = vmatpush.bf16.msrb.mxu3 %v3365_v0  ;;  %1435 = vmatpush.bf16.msrb.mxu1 %v3237_v3  ;;  %v4404_v15 = vor.u32 %v3639_v10, %v2742_v11  ;;  %v3164_v18 = vld [vmem:[%s5804_s1 + $0x220] sm:$0xf]  ;;  %v3293_v19 = vor.u32 %v3779_v17, %v3292_v16  ;;  %v3747_v20 = vld [vmem:[%s5804_s1 + $0x224] sm:$0xf0]  ;;  %v3646_v34 = vld [vmem:[%s5803_s0 + $0x104] sm:$0xf] }
  0x3a   :  { %v3356_v21 = vld [vmem:[%s5804_s1 + $0x3a0] sm:$0xf]  ;;  %v3795_v22 = vld [vmem:[%s5804_s1 + $0x3a4] sm:$0xf0]  ;;  %v3165_v23 = vor.u32 %v3747_v20, %v3164_v18  ;;  %v2766_v35 = vld [vmem:[%s5803_s0 + $0x120] sm:$0xf0] }
  0x3b   :  { %v3357_v28 = vor.u32 %v3795_v22, %v3356_v21  ;;  %v3228_v29 = vld [vmem:[%s5804_s1 + $0x2a0] sm:$0xf]  ;;  %v3763_v30 = vld [vmem:[%s5804_s1 + $0x2a4] sm:$0xf0]  ;;  %1485 = vmatpush.bf16.msrb.mxu2 %v3293_v19  ;;  %v3647_v38 = vld [vmem:[%s5803_s0 + $0x10c] sm:$0xf]  ;;  %v4460_v41 = vor.u32 %v3646_v34, %v2766_v35 }
  0x3c   :  { %v3229_v31 = vor.u32 %v3763_v30, %v3228_v29  ;;  %1387 = vmatpush.bf16.msrb.mxu0 %v3165_v23  ;;  %v2764_v32 = vld [vmem:[%s5803_s0 + $0x100] sm:$0xf]  ;;  %v2772_v36 = vld [vmem:[%s5803_s0 + $0x108] sm:$0xf]  ;;  %v2774_v39 = vld [vmem:[%s5803_s0 + $0x128] sm:$0xf0] }
  0x3d   :  { %1534 = vmatpush.bf16.msrb.mxu3 %v3357_v28  ;;  %v3650_v33 = vld [vmem:[%s5803_s0 + $0x11c] sm:$0xf0]  ;;  %v3651_v37 = vld [vmem:[%s5803_s0 + $0x124] sm:$0xf0]  ;;  %v4464_v43 = vor.u32 %v3647_v38, %v2774_v39  ;;  %v3284_v44 = vld [vmem:[%s5804_s1 + $0x310] sm:$0xf] }
  0x3e   :  { %1436 = vmatpush.bf16.msrb.mxu1 %v3229_v31  ;;  %v4458_v40 = vor.u32 %v3650_v33, %v2764_v32  ;;  %v4462_v42 = vor.u32 %v3651_v37, %v2772_v36  ;;  %v3777_v45 = vld [vmem:[%s5804_s1 + $0x314] sm:$0xf0]  ;;  %v3156_v46 = vld [vmem:[%s5804_s1 + $0x210] sm:$0xf]  ;;  %v2796_v0 = vld [vmem:[%s5803_s0 + $0x140] sm:$0xf] }
  0x3f   :  { %v3285_v47 = vor.u32 %v3777_v45, %v3284_v44  ;;  %v3745_v55 = vld [vmem:[%s5804_s1 + $0x214] sm:$0xf0]  ;;  %v3348_v56 = vld [vmem:[%s5804_s1 + $0x390] sm:$0xf]  ;;  %v3658_v1 = vld [vmem:[%s5803_s0 + $0x15c] sm:$0xf0] }
  0x40   :  { %v3793_v58 = vld [vmem:[%s5804_s1 + $0x394] sm:$0xf0]  ;;  %v3157_v59 = vor.u32 %v3745_v55, %v3156_v46  ;;  %v3220_v61 = vld [vmem:[%s5804_s1 + $0x290] sm:$0xf]  ;;  %v3654_v2 = vld [vmem:[%s5803_s0 + $0x144] sm:$0xf]  ;;  %v4518_v8 = vor.u32 %v3658_v1, %v2796_v0 }
  0x41   :  { %v3349_v60 = vor.u32 %v3793_v58, %v3348_v56  ;;  %v3761_v62 = vld [vmem:[%s5804_s1 + $0x294] sm:$0xf0]  ;;  %1486 = vmatpush.bf16.msrb.mxu2 %v3285_v47  ;;  %v2798_v3 = vld [vmem:[%s5803_s0 + $0x160] sm:$0xf0]  ;;  %v2804_v4 = vld [vmem:[%s5803_s0 + $0x148] sm:$0xf] }
  0x42   :  { %v3221_v63 = vor.u32 %v3761_v62, %v3220_v61  ;;  %1388 = vmatpush.bf16.msrb.mxu0 %v3157_v59  ;;  %v3659_v5 = vld [vmem:[%s5803_s0 + $0x164] sm:$0xf0]  ;;  %v3655_v6 = vld [vmem:[%s5803_s0 + $0x14c] sm:$0xf]  ;;  %v4520_v9 = vor.u32 %v3654_v2, %v2798_v3  ;;  %v3276_v16 = vld [vmem:[%s5804_s1 + $0x300] sm:$0xf] }
  0x43   :  { %1204 = vmatmul.bf16.gmra.mxu0 %v4338_v49  ;;  %1535 = vmatpush.bf16.msrb.mxu3 %v3349_v60  ;;  %v2806_v7 = vld [vmem:[%s5803_s0 + $0x168] sm:$0xf0]  ;;  %v4522_v10 = vor.u32 %v3659_v5, %v2804_v4  ;;  %v3775_v17 = vld [vmem:[%s5804_s1 + $0x304] sm:$0xf0]  ;;  %v3148_v18 = vld [vmem:[%s5804_s1 + $0x200] sm:$0xf] }
  0x44   :  { %1253 = vmatmul.bf16.gmra.mxu1 %v4340_v50  ;;  %v4524_v11 = vor.u32 %v3655_v6, %v2806_v7  ;;  %v3277_v19 = vor.u32 %v3775_v17, %v3276_v16  ;;  %v3743_v20 = vld [vmem:[%s5804_s1 + $0x204] sm:$0xf0]  ;;  %v3340_v21 = vld [vmem:[%s5804_s1 + $0x380] sm:$0xf]  ;;  %v3662_v34 = vld [vmem:[%s5803_s0 + $0x184] sm:$0xf] }
  0x45   :  { %1302 = vmatmul.bf16.gmra.mxu2 %v4342_v51  ;;  %1437 = vmatpush.bf16.msrb.mxu1 %v3221_v63  ;;  %v3791_v22 = vld [vmem:[%s5804_s1 + $0x384] sm:$0xf0]  ;;  %v3149_v23 = vor.u32 %v3743_v20, %v3148_v18  ;;  %v3212_v29 = vld [vmem:[%s5804_s1 + $0x280] sm:$0xf]  ;;  %v2830_v35 = vld [vmem:[%s5803_s0 + $0x1a0] sm:$0xf0] }
  0x46   :  { %v3341_v28 = vor.u32 %v3791_v22, %v3340_v21  ;;  %v3759_v30 = vld [vmem:[%s5804_s1 + $0x284] sm:$0xf0]  ;;  %1487 = vmatpush.bf16.msrb.mxu2 %v3277_v19  ;;  %v2828_v32 = vld [vmem:[%s5803_s0 + $0x180] sm:$0xf]  ;;  %v3663_v38 = vld [vmem:[%s5803_s0 + $0x18c] sm:$0xf]  ;;  %v4580_v45 = vor.u32 %v3662_v34, %v2830_v35 }
  0x47   :  { %v3213_v31 = vor.u32 %v3759_v30, %v3212_v29  ;;  %1389 = vmatpush.bf16.msrb.mxu0 %v3149_v23  ;;  %v3666_v33 = vld [vmem:[%s5803_s0 + $0x19c] sm:$0xf0]  ;;  %v2836_v36 = vld [vmem:[%s5803_s0 + $0x188] sm:$0xf]  ;;  %v2838_v39 = vld [vmem:[%s5803_s0 + $0x1a8] sm:$0xf0] }
  0x48   :  { %1351 = vmatmul.bf16.gmra.mxu3 %v4344_v52  ;;  %v3667_v37 = vld [vmem:[%s5803_s0 + $0x1a4] sm:$0xf0]  ;;  %v4578_v44 = vor.u32 %v3666_v33, %v2828_v32  ;;  %v4584_v47 = vor.u32 %v3663_v38, %v2838_v39  ;;  %v3724_v55 = vld [vmem:[%s5804_s1 + $0x174] sm:$0xf]  ;;  %v3078_v56 = vld [vmem:[%s5804_s1 + $0x178] sm:$0xf0] }
  0x49   :  { %1536 = vmatpush.bf16.msrb.mxu3 %v3341_v28  ;;  %1438 = vmatpush.bf16.msrb.mxu1 %v3213_v31  ;;  %v4582_v46 = vor.u32 %v3667_v37, %v2836_v36  ;;  %v3692_v58 = vld [vmem:[%s5804_s1 + $0x74] sm:$0xf]  ;;  %v3081_v59 = vor.u32 %v3724_v55, %v3078_v56  ;;  %v2950_v60 = vld [vmem:[%s5804_s1 + $0x78] sm:$0xf0]  ;;  %v2860_v4 = vld [vmem:[%s5803_s0 + $0x1c0] sm:$0xf] }
  0x4a   :  { %v3740_v61 = vld [vmem:[%s5804_s1 + $0x1f4] sm:$0xf]  ;;  %v3142_v62 = vld [vmem:[%s5804_s1 + $0x1f8] sm:$0xf0]  ;;  %v2953_v63 = vor.u32 %v3692_v58, %v2950_v60  ;;  %v3674_v5 = vld [vmem:[%s5803_s0 + $0x1dc] sm:$0xf0] }
  0x4b   :  { %v3145_v0 = vor.u32 %v3740_v61, %v3142_v62  ;;  %1676 = vmatpush.bf16.msra.mxu2 %v3081_v59  ;;  %v3708_v1 = vld [vmem:[%s5804_s1 + $0xf4] sm:$0xf]  ;;  %v3014_v2 = vld [vmem:[%s5804_s1 + $0xf8] sm:$0xf0]  ;;  %v3670_v6 = vld [vmem:[%s5803_s0 + $0x1c4] sm:$0xf]  ;;  %v4638_v20 = vor.u32 %v3674_v5, %v2860_v4 }
  0x4c   :  { %1578 = vmatpush.bf16.msra.mxu0 %v2953_v63  ;;  %v3017_v3 = vor.u32 %v3708_v1, %v3014_v2  ;;  %v2862_v7 = vld [vmem:[%s5803_s0 + $0x1e0] sm:$0xf0]  ;;  %v2868_v16 = vld [vmem:[%s5803_s0 + $0x1c8] sm:$0xf]  ;;  %v3671_v18 = vld [vmem:[%s5803_s0 + $0x1cc] sm:$0xf] }
  0x4d   :  { %1725 = vmatpush.bf16.msra.mxu3 %v3145_v0  ;;  %v3675_v17 = vld [vmem:[%s5803_s0 + $0x1e4] sm:$0xf0]  ;;  %v2870_v19 = vld [vmem:[%s5803_s0 + $0x1e8] sm:$0xf0]  ;;  %v4640_v21 = vor.u32 %v3670_v6, %v2862_v7  ;;  %v3722_v28 = vld [vmem:[%s5804_s1 + $0x164] sm:$0xf] }
  0x4e   :  { %1627 = vmatpush.bf16.msra.mxu1 %v3017_v3  ;;  %v4642_v22 = vor.u32 %v3675_v17, %v2868_v16  ;;  %v4644_v23 = vor.u32 %v3671_v18, %v2870_v19  ;;  %v3070_v29 = vld [vmem:[%s5804_s1 + $0x168] sm:$0xf0]  ;;  %v3690_v30 = vld [vmem:[%s5804_s1 + $0x64] sm:$0xf]  ;;  %v2652_v55 = vld [vmem:[%s5803_s0 + $0x10] sm:$0xf] }
  0x4f   :  { %v3073_v31 = vor.u32 %v3722_v28, %v3070_v29  ;;  %v2942_v32 = vld [vmem:[%s5804_s1 + $0x68] sm:$0xf0]  ;;  %v3738_v33 = vld [vmem:[%s5804_s1 + $0x1e4] sm:$0xf]  ;;  %v3620_v56 = vld [vmem:[%s5803_s0 + $0x2c] sm:$0xf0] }
  0x50   :  { %5844 = vst [vmem:[#allocation5_spill] sm:$0xff] %v4644_v23  ;;  %v3134_v34 = vld [vmem:[%s5804_s1 + $0x1e8] sm:$0xf0]  ;;  %v2945_v35 = vor.u32 %v3690_v30, %v2942_v32  ;;  %v3706_v37 = vld [vmem:[%s5804_s1 + $0xe4] sm:$0xf]  ;;  %v4698_v0 = vor.u32 %v3620_v56, %v2652_v55  ;;  %vm2229_vm0 = vcmask 261120  }
  0x51   :  { %v3137_v36 = vor.u32 %v3738_v33, %v3134_v34  ;;  %1677 = vmatpush.bf16.msra.mxu2 %v3073_v31  ;;  %v3006_v38 = vld [vmem:[%s5804_s1 + $0xe8] sm:$0xf0]  ;;  %v3616_v58 = vld [vmem:[%s5803_s0 + $0x14] sm:$0xf]  ;;  %v2660_v60 = vld [vmem:[%s5803_s0 + $0x18] sm:$0xf] }
  0x52   :  { %1579 = vmatpush.bf16.msra.mxu0 %v2945_v35  ;;  %v3009_v39 = vor.u32 %v3706_v37, %v3006_v38  ;;  %v2654_v59 = vld [vmem:[%s5803_s0 + $0x30] sm:$0xf0]  ;;  %v3621_v61 = vld [vmem:[%s5803_s0 + $0x34] sm:$0xf0]  ;;  %v3617_v62 = vld [vmem:[%s5803_s0 + $0x1c] sm:$0xf] }
  0x53   :  { %1209 = vmatmul.bf16.gmra.mxu0 %v4398_v12  ;;  %1726 = vmatpush.bf16.msra.mxu3 %v3137_v36  ;;  %v2662_v63 = vld [vmem:[%s5803_s0 + $0x38] sm:$0xf0]  ;;  %5845 = vst [vmem:[#allocation6_spill] sm:$0xff] %v4698_v0  ;;  %v4700_v2 = vor.u32 %v3616_v58, %v2654_v59  ;;  %v4702_v3 = vor.u32 %v3621_v61, %v2660_v60  ;;  %v3720_v7 = vld [vmem:[%s5804_s1 + $0x154] sm:$0xf]  ;;  %vm2592_vm1 = vcmask 9216  }
  0x54   :  { %1258 = vmatmul.bf16.gmra.mxu1 %v4400_v13  ;;  %v4704_v5 = vor.u32 %v3617_v62, %v2662_v63  ;;  %v3062_v16 = vld [vmem:[%s5804_s1 + $0x158] sm:$0xf0]  ;;  %v3688_v17 = vld [vmem:[%s5804_s1 + $0x54] sm:$0xf]  ;;  %v2684_v58 = vld [vmem:[%s5803_s0 + $0x50] sm:$0xf] }
  0x55   :  { %1307 = vmatmul.bf16.gmra.mxu2 %v4402_v14  ;;  %1628 = vmatpush.bf16.msra.mxu1 %v3009_v39  ;;  %5846 = vst [vmem:[#allocation7_spill] sm:$0xff] %v4700_v2  ;;  %v3065_v18 = vor.u32 %v3720_v7, %v3062_v16  ;;  %v2934_v19 = vld [vmem:[%s5804_s1 + $0x58] sm:$0xf0]  ;;  %v3736_v28 = vld [vmem:[%s5804_s1 + $0x1d4] sm:$0xf]  ;;  %s2625_s22 = sshll.u32 %s5812_s9, 4  ;;  %s2626_s22 = int_to_ptr.hbm [resolvable:$true] %s2625_s22 }
  0x56   :  { %5847 = vst [vmem:[#allocation8_spill] sm:$0xff] %v4702_v3  ;;  %v3126_v29 = vld [vmem:[%s5804_s1 + $0x1d8] sm:$0xf0]  ;;  %v2937_v31 = vor.u32 %v3688_v17, %v2934_v19  ;;  %v3704_v39 = vld [vmem:[%s5804_s1 + $0xd4] sm:$0xf] }
  0x57   :  { %5848 = vst [vmem:[#allocation9_spill] sm:$0xff] %v4704_v5  ;;  %v3129_v32 = vor.u32 %v3736_v28, %v3126_v29  ;;  %1678 = vmatpush.bf16.msra.mxu2 %v3065_v18  ;;  %v2998_v55 = vld [vmem:[%s5804_s1 + $0xd8] sm:$0xf0]  ;;  %v3628_v59 = vld [vmem:[%s5803_s0 + $0x6c] sm:$0xf0] }
  0x58   :  { %1356 = vmatmul.bf16.gmra.mxu3 %v4404_v15  ;;  %1580 = vmatpush.bf16.msra.mxu0 %v2937_v31  ;;  %v3001_v56 = vor.u32 %v3704_v39, %v2998_v55  ;;  %v3624_v60 = vld [vmem:[%s5803_s0 + $0x54] sm:$0xf]  ;;  %v2692_v62 = vld [vmem:[%s5803_s0 + $0x58] sm:$0xf]  ;;  %v4760_v7 = vor.u32 %v3628_v59, %v2684_v58  ;;  %v3734_v39 = vld [vmem:[%s5804_s1 + $0x1c4] sm:$0xf] }
  0x59   :  { %1727 = vmatpush.bf16.msra.mxu3 %v3129_v32  ;;  %v2686_v61 = vld [vmem:[%s5803_s0 + $0x70] sm:$0xf0]  ;;  %v3629_v63 = vld [vmem:[%s5803_s0 + $0x74] sm:$0xf0]  ;;  %v3118_v55 = vld [vmem:[%s5804_s1 + $0x1c8] sm:$0xf0] }
  0x5a   :  { %1629 = vmatpush.bf16.msra.mxu1 %v3001_v56  ;;  %5849 = vst [vmem:[#allocation10_spill] sm:$0xff] %v4760_v7  ;;  %v4762_v19 = vor.u32 %v3624_v60, %v2686_v61  ;;  %v4764_v28 = vor.u32 %v3629_v63, %v2692_v62  ;;  %v3121_v59 = vor.u32 %v3734_v39, %v3118_v55 }
  0x5c   :  { %5850 = vst [vmem:[#allocation11_spill] sm:$0xff] %v4762_v19 }
  0x5d   :  { %5851 = vst [vmem:[#allocation12_spill] sm:$0xff] %v4764_v28  ;;  %1728 = vmatpush.bf16.msra.mxu3 %v3121_v59 }
  0x63   :  { %1214 = vmatmul.bf16.gmra.mxu0 %v4458_v40 }
  0x64   :  { %1263 = vmatmul.bf16.gmra.mxu1 %v4460_v41 }
  0x65   :  { %1312 = vmatmul.bf16.gmra.mxu2 %v4462_v42 }
  0x68   :  { %1361 = vmatmul.bf16.gmra.mxu3 %v4464_v43 }
  0x73   :  { %1219 = vmatmul.bf16.gmra.mxu0 %v4518_v8 }
  0x74   :  { %1268 = vmatmul.bf16.gmra.mxu1 %v4520_v9 }
  0x75   :  { %1317 = vmatmul.bf16.gmra.mxu2 %v4522_v10 }
  0x78   :  { %1366 = vmatmul.bf16.gmra.mxu3 %v4524_v11 }
  0x83   :  { %1224 = vmatmul.bf16.gmra.mxu0 %v4578_v44 }
  0x84   :  { %1273 = vmatmul.bf16.gmra.mxu1 %v4580_v45 }
  0x85   :  { %1322 = vmatmul.bf16.gmra.mxu2 %v4582_v46 }
  0x88   :  { %1371 = vmatmul.bf16.gmra.mxu3 %v4584_v47 }
  0x93   :  { %1229 = vmatmul.bf16.gmra.mxu0 %v4638_v20 }
  0x94   :  { %1278 = vmatmul.bf16.gmra.mxu1 %v4640_v21 }
  0x95   :  { %1327 = vmatmul.bf16.gmra.mxu2 %v4642_v22 }
  0x98   :  { %1376 = vmatmul.bf16.gmra.mxu3 %v4644_v23 }
  0xa0   :  { %v1195_v1 = vpop.f32.mrf.mxu0 }
  0xa1   :  { %v1244_v4 = vpop.f32.mrf.mxu1 }
  0xa2   :  { %v1245_v6 = vadd.f32 %v1244_v4, %v1195_v1  ;;  %v3625_v1 = vld [vmem:[%s5803_s0 + $0x5c] sm:$0xf] }
  0xa3   :  { %1390 = vmatmul.bf16.vlgmr.msrb.gmra.mxu0 %v4698_v0  ;;  %v2694_v4 = vld [vmem:[%s5803_s0 + $0x78] sm:$0xf0] }
  0xa4   :  { %1439 = vmatmul.bf16.vlgmr.msrb.gmra.mxu1 %v4700_v2 }
  0xa5   :  { %1488 = vmatmul.bf16.vlgmr.msrb.gmra.mxu2 %v4702_v3 }
  0xa8   :  { %1537 = vmatmul.bf16.vlgmr.msrb.gmra.mxu3 %v4704_v5  ;;  %v1293_v30 = vpop.f32.mrf.mxu2  ;;  %v1197_v35 = vpop.f32.mrf.mxu0 }
  0xa9   :  { %v1294_v33 = vadd.f32 %v1293_v30, %v1245_v6  ;;  %v1246_v36 = vpop.f32.mrf.mxu1  ;;  %v4766_v30 = vor.u32 %v3625_v1, %v2694_v4 }
  0xaa   :  { %v1247_v38 = vadd.f32 %v1246_v36, %v1197_v35  ;;  %v3686_v35 = vld [vmem:[%s5804_s1 + $0x44] sm:$0xf] }
  0xab   :  { %v1342_v34 = vpop.f32.mrf.mxu3  ;;  %5852 = vst [vmem:[#allocation13_spill] sm:$0xff] %v4766_v30 }
  0xac   :  { %v4728_v37 = vadd.f32 %v1342_v34, %v1294_v33  ;;  %v3718_v33 = vld [vmem:[%s5804_s1 + $0x144] sm:$0xf]  ;;  %v3054_v34 = vld [vmem:[%s5804_s1 + $0x148] sm:$0xf0] }
  0xad   :  { %v3057_v36 = vor.u32 %v3718_v33, %v3054_v34  ;;  %v2718_v33 = vld [vmem:[%s5803_s0 + $0xb0] sm:$0xf0]  ;;  %v2724_v34 = vld [vmem:[%s5803_s0 + $0x98] sm:$0xf] }
  0xaf   :  { %1679 = vmatpush.bf16.msra.mxu2 %v3057_v36  ;;  %v3633_v36 = vld [vmem:[%s5803_s0 + $0x9c] sm:$0xf] }
  0xb0   :  { %v1295_v6 = vpop.f32.mrf.mxu2  ;;  %v1200_v18 = vpop.f32.mrf.mxu0 }
  0xb1   :  { %v1296_v16 = vadd.f32 %v1295_v6, %v1247_v38  ;;  %v1249_v29 = vpop.f32.mrf.mxu1  ;;  %v2926_v38 = vld [vmem:[%s5804_s1 + $0x48] sm:$0xf0]  ;;  %v3702_v6 = vld [vmem:[%s5804_s1 + $0xc4] sm:$0xf] }
  0xb2   :  { %v1250_v32 = vadd.f32 %v1249_v29, %v1200_v18  ;;  %v2929_v58 = vor.u32 %v3686_v35, %v2926_v38  ;;  %v2716_v18 = vld [vmem:[%s5803_s0 + $0x90] sm:$0xf]  ;;  %v3637_v35 = vld [vmem:[%s5803_s0 + $0xb4] sm:$0xf0]  ;;  %v2726_v38 = vld [vmem:[%s5803_s0 + $0xb8] sm:$0xf0] }
  0xb3   :  { %v1344_v17 = vpop.f32.mrf.mxu3  ;;  %1395 = vmatmul.bf16.gmra.mxu0 %v4760_v7  ;;  %v3636_v29 = vld [vmem:[%s5803_s0 + $0xac] sm:$0xf0] }
  0xb4   :  { %v4768_v31 = vadd.f32 %v1344_v17, %v1296_v16  ;;  %1444 = vmatmul.bf16.gmra.mxu1 %v4762_v19  ;;  %1581 = vmatpush.bf16.msra.mxu0 %v2929_v58  ;;  %v2990_v16 = vld [vmem:[%s5804_s1 + $0xc8] sm:$0xf0]  ;;  %v4824_v55 = vor.u32 %v3636_v29, %v2716_v18  ;;  %v3684_v18 = vld [vmem:[%s5804_s1 + $0x34] sm:$0xf] }
  0xb5   :  { %1493 = vmatmul.bf16.gmra.mxu2 %v4764_v28  ;;  %v2993_v17 = vor.u32 %v3702_v6, %v2990_v16 }
  0xb6   :  { %5853 = vst [vmem:[#allocation14_spill] sm:$0xff] %v4824_v55 }
  0xb7   :  { %1630 = vmatpush.bf16.msra.mxu1 %v2993_v17  ;;  %v3046_v17 = vld [vmem:[%s5804_s1 + $0x138] sm:$0xf0] }
  0xb8   :  { %1542 = vmatmul.bf16.gmra.mxu3 %v4766_v30  ;;  %v1298_v56 = vpop.f32.mrf.mxu2  ;;  %v1202_v62 = vpop.f32.mrf.mxu0 }
  0xb9   :  { %v1299_v60 = vadd.f32 %v1298_v56, %v1250_v32  ;;  %v1251_v63 = vpop.f32.mrf.mxu1  ;;  %v3632_v32 = vld [vmem:[%s5803_s0 + $0x94] sm:$0xf] }
  0xba   :  { %v1252_v4 = vadd.f32 %v1251_v63, %v1202_v62  ;;  %v4830_v63 = vor.u32 %v3633_v36, %v2726_v38 }
  0xbb   :  { %v1347_v61 = vpop.f32.mrf.mxu3 }
  0xbc   :  { %v4792_v1 = vadd.f32 %v1347_v61, %v1299_v60  ;;  %v4826_v60 = vor.u32 %v3632_v32, %v2718_v33  ;;  %v4828_v61 = vor.u32 %v3637_v35, %v2724_v34  ;;  %5856 = vst [vmem:[#allocation17_spill] sm:$0xff] %v4830_v63  ;;  %v2918_v32 = vld [vmem:[%s5804_s1 + $0x38] sm:$0xf0]  ;;  %v3732_v33 = vld [vmem:[%s5804_s1 + $0x1b4] sm:$0xf] }
  0xbd   :  { %v3110_v34 = vld [vmem:[%s5804_s1 + $0x1b8] sm:$0xf0]  ;;  %v2921_v36 = vor.u32 %v3684_v18, %v2918_v32  ;;  %v3640_v32 = vld [vmem:[%s5803_s0 + $0xd4] sm:$0xf] }
  0xbe   :  { %5854 = vst [vmem:[#allocation15_spill] sm:$0xff] %v4826_v60  ;;  %v3113_v38 = vor.u32 %v3732_v33, %v3110_v34  ;;  %v2750_v33 = vld [vmem:[%s5803_s0 + $0xf0] sm:$0xf0]  ;;  %v3645_v34 = vld [vmem:[%s5803_s0 + $0xf4] sm:$0xf0] }
  0xbf   :  { %5855 = vst [vmem:[#allocation16_spill] sm:$0xff] %v4828_v61  ;;  %1582 = vmatpush.bf16.msra.mxu0 %v2921_v36  ;;  %v2758_v36 = vld [vmem:[%s5803_s0 + $0xf8] sm:$0xf0] }
  0xc0   :  { %v1300_v39 = vpop.f32.mrf.mxu2  ;;  %v1205_v59 = vpop.f32.mrf.mxu0  ;;  %1729 = vmatpush.bf16.msra.mxu3 %v3113_v38 }
  0xc1   :  { %v1301_v56 = vadd.f32 %v1300_v39, %v1252_v4  ;;  %v1254_v62 = vpop.f32.mrf.mxu1  ;;  %v3716_v4 = vld [vmem:[%s5804_s1 + $0x134] sm:$0xf] }
  0xc2   :  { %v1255_v16 = vadd.f32 %v1254_v62, %v1205_v59  ;;  %v3049_v29 = vor.u32 %v3716_v4, %v3046_v17  ;;  %v3700_v17 = vld [vmem:[%s5804_s1 + $0xb4] sm:$0xf] }
  0xc3   :  { %v1349_v58 = vpop.f32.mrf.mxu3  ;;  %1400 = vmatmul.bf16.gmra.mxu0 %v4824_v55 }
  0xc4   :  { %v4832_v6 = vadd.f32 %v1349_v58, %v1301_v56  ;;  %1449 = vmatmul.bf16.gmra.mxu1 %v4826_v60  ;;  %1680 = vmatpush.bf16.msra.mxu2 %v3049_v29  ;;  %v3644_v29 = vld [vmem:[%s5803_s0 + $0xec] sm:$0xf0] }
  0xc5   :  { %1498 = vmatmul.bf16.gmra.mxu2 %v4828_v61 }
  0xc8   :  { %1547 = vmatmul.bf16.gmra.mxu3 %v4830_v63  ;;  %v1303_v35 = vpop.f32.mrf.mxu2  ;;  %v1207_v58 = vpop.f32.mrf.mxu0  ;;  %v2982_v63 = vld [vmem:[%s5804_s1 + $0xb8] sm:$0xf0] }
  0xc9   :  { %v1304_v39 = vadd.f32 %v1303_v35, %v1255_v16  ;;  %v1256_v59 = vpop.f32.mrf.mxu1  ;;  %v2985_v18 = vor.u32 %v3700_v17, %v2982_v63  ;;  %v2748_v16 = vld [vmem:[%s5803_s0 + $0xd0] sm:$0xf]  ;;  %v2756_v63 = vld [vmem:[%s5803_s0 + $0xd8] sm:$0xf]  ;;  %v3641_v35 = vld [vmem:[%s5803_s0 + $0xdc] sm:$0xf]  ;;  %v4890_v17 = vor.u32 %v3640_v32, %v2750_v33 }
  0xca   :  { %v1257_v4 = vadd.f32 %v1256_v59, %v1207_v58  ;;  %v4892_v61 = vor.u32 %v3645_v34, %v2756_v63  ;;  %v2910_v32 = vld [vmem:[%s5804_s1 + $0x28] sm:$0xf0]  ;;  %v3730_v33 = vld [vmem:[%s5804_s1 + $0x1a4] sm:$0xf] }
  0xcb   :  { %v1352_v56 = vpop.f32.mrf.mxu3  ;;  %1631 = vmatpush.bf16.msra.mxu1 %v2985_v18  ;;  %5858 = vst [vmem:[#allocation19_spill] sm:$0xff] %v4890_v17  ;;  %v4894_v18 = vor.u32 %v3641_v35, %v2758_v36  ;;  %v3102_v63 = vld [vmem:[%s5804_s1 + $0x1a8] sm:$0xf0] }
  0xcc   :  { %v4856_v62 = vadd.f32 %v1352_v56, %v1304_v39  ;;  %v4888_v39 = vor.u32 %v3644_v29, %v2748_v16  ;;  %5859 = vst [vmem:[#allocation20_spill] sm:$0xff] %v4892_v61  ;;  %v3038_v16 = vld [vmem:[%s5804_s1 + $0x128] sm:$0xf0]  ;;  %v3105_v36 = vor.u32 %v3730_v33, %v3102_v63  ;;  %v2782_v33 = vld [vmem:[%s5803_s0 + $0x130] sm:$0xf0] }
  0xcd   :  { %5860 = vst [vmem:[#allocation21_spill] sm:$0xff] %v4894_v18  ;;  %v3649_v63 = vld [vmem:[%s5803_s0 + $0x11c] sm:$0xf] }
  0xce   :  { %5857 = vst [vmem:[#allocation18_spill] sm:$0xff] %v4888_v39  ;;  %1730 = vmatpush.bf16.msra.mxu3 %v3105_v36 }
  0xd0   :  { %v1305_v38 = vpop.f32.mrf.mxu2  ;;  %v1210_v59 = vpop.f32.mrf.mxu0 }
  0xd1   :  { %v1306_v56 = vadd.f32 %v1305_v38, %v1257_v4  ;;  %v1259_v60 = vpop.f32.mrf.mxu1  ;;  %v3714_v4 = vld [vmem:[%s5804_s1 + $0x124] sm:$0xf] }
  0xd2   :  { %v1260_v30 = vadd.f32 %v1259_v60, %v1210_v59  ;;  %v3682_v60 = vld [vmem:[%s5804_s1 + $0x24] sm:$0xf]  ;;  %v3041_v29 = vor.u32 %v3714_v4, %v3038_v16 }
  0xd3   :  { %v1354_v58 = vpop.f32.mrf.mxu3  ;;  %1405 = vmatmul.bf16.gmra.mxu0 %v4888_v39  ;;  %v2913_v35 = vor.u32 %v3682_v60, %v2910_v32  ;;  %v3648_v32 = vld [vmem:[%s5803_s0 + $0x114] sm:$0xf] }
  0xd4   :  { %v4896_v55 = vadd.f32 %v1354_v58, %v1306_v56  ;;  %1454 = vmatmul.bf16.gmra.mxu1 %v4890_v17  ;;  %1681 = vmatpush.bf16.msra.mxu2 %v3041_v29  ;;  %v3652_v29 = vld [vmem:[%s5803_s0 + $0x12c] sm:$0xf0] }
  0xd5   :  { %1503 = vmatmul.bf16.gmra.mxu2 %v4892_v61  ;;  %1583 = vmatpush.bf16.msra.mxu0 %v2913_v35  ;;  %v2974_v61 = vld [vmem:[%s5804_s1 + $0xa8] sm:$0xf0] }
  0xd8   :  { %1552 = vmatmul.bf16.gmra.mxu3 %v4894_v18  ;;  %v1308_v34 = vpop.f32.mrf.mxu2  ;;  %v1212_v58 = vpop.f32.mrf.mxu0  ;;  %v3698_v18 = vld [vmem:[%s5804_s1 + $0xa4] sm:$0xf] }
  0xd9   :  { %v1309_v38 = vadd.f32 %v1308_v34, %v1260_v30  ;;  %v1261_v59 = vpop.f32.mrf.mxu1  ;;  %v2977_v60 = vor.u32 %v3698_v18, %v2974_v61  ;;  %v2780_v30 = vld [vmem:[%s5803_s0 + $0x110] sm:$0xf]  ;;  %v2788_v61 = vld [vmem:[%s5803_s0 + $0x118] sm:$0xf]  ;;  %v2790_v34 = vld [vmem:[%s5803_s0 + $0x138] sm:$0xf0] }
  0xda   :  { %v1262_v16 = vadd.f32 %v1261_v59, %v1212_v58  ;;  %v3653_v18 = vld [vmem:[%s5803_s0 + $0x134] sm:$0xf0]  ;;  %v4952_v36 = vor.u32 %v3652_v29, %v2780_v30  ;;  %v4954_v59 = vor.u32 %v3648_v32, %v2782_v33  ;;  %v3030_v30 = vld [vmem:[%s5804_s1 + $0x118] sm:$0xf0]  ;;  %v3728_v33 = vld [vmem:[%s5804_s1 + $0x194] sm:$0xf] }
  0xdb   :  { %v1357_v56 = vpop.f32.mrf.mxu3  ;;  %1632 = vmatpush.bf16.msra.mxu1 %v2977_v60  ;;  %v4956_v17 = vor.u32 %v3653_v18, %v2788_v61  ;;  %v4958_v60 = vor.u32 %v3649_v63, %v2790_v34  ;;  %v2902_v32 = vld [vmem:[%s5804_s1 + $0x18] sm:$0xf0] }
  0xdc   :  { %v4920_v4 = vadd.f32 %v1357_v56, %v1309_v38  ;;  %5861 = vst [vmem:[#allocation22_spill] sm:$0xff] %v4952_v36  ;;  %v3094_v61 = vld [vmem:[%s5804_s1 + $0x198] sm:$0xf0] }
  0xdd   :  { %5862 = vst [vmem:[#allocation23_spill] sm:$0xff] %v4954_v59  ;;  %v3097_v34 = vor.u32 %v3728_v33, %v3094_v61  ;;  %v2814_v33 = vld [vmem:[%s5803_s0 + $0x170] sm:$0xf0]  ;;  %v3657_v61 = vld [vmem:[%s5803_s0 + $0x15c] sm:$0xf] }
  0xde   :  { %5863 = vst [vmem:[#allocation24_spill] sm:$0xff] %v4956_v17 }
  0xdf   :  { %5864 = vst [vmem:[#allocation25_spill] sm:$0xff] %v4958_v60  ;;  %1731 = vmatpush.bf16.msra.mxu3 %v3097_v34 }
  0xe0   :  { %v1310_v35 = vpop.f32.mrf.mxu2  ;;  %v1215_v58 = vpop.f32.mrf.mxu0 }
  0xe1   :  { %v1311_v38 = vadd.f32 %v1310_v35, %v1262_v16  ;;  %v1264_v39 = vpop.f32.mrf.mxu1  ;;  %v3712_v16 = vld [vmem:[%s5804_s1 + $0x114] sm:$0xf] }
  0xe2   :  { %v1265_v19 = vadd.f32 %v1264_v39, %v1215_v58  ;;  %v3680_v39 = vld [vmem:[%s5804_s1 + $0x14] sm:$0xf]  ;;  %v3033_v29 = vor.u32 %v3712_v16, %v3030_v30 }
  0xe3   :  { %v1359_v56 = vpop.f32.mrf.mxu3  ;;  %1410 = vmatmul.bf16.gmra.mxu0 %v4952_v36  ;;  %v2905_v63 = vor.u32 %v3680_v39, %v2902_v32  ;;  %v3656_v32 = vld [vmem:[%s5803_s0 + $0x154] sm:$0xf] }
  0xe4   :  { %v4960_v28 = vadd.f32 %v1359_v56, %v1311_v38  ;;  %1459 = vmatmul.bf16.gmra.mxu1 %v4954_v59  ;;  %1682 = vmatpush.bf16.msra.mxu2 %v3033_v29  ;;  %v3660_v29 = vld [vmem:[%s5803_s0 + $0x16c] sm:$0xf0] }
  0xe5   :  { %1508 = vmatmul.bf16.gmra.mxu2 %v4956_v17  ;;  %1584 = vmatpush.bf16.msra.mxu0 %v2905_v63  ;;  %v2966_v17 = vld [vmem:[%s5804_s1 + $0x98] sm:$0xf0] }
  0xe8   :  { %1557 = vmatmul.bf16.gmra.mxu3 %v4958_v60  ;;  %v1313_v18 = vpop.f32.mrf.mxu2  ;;  %v1217_v56 = vpop.f32.mrf.mxu0  ;;  %v3696_v60 = vld [vmem:[%s5804_s1 + $0x94] sm:$0xf] }
  0xe9   :  { %v1314_v35 = vadd.f32 %v1313_v18, %v1265_v19  ;;  %v1266_v58 = vpop.f32.mrf.mxu1  ;;  %v2969_v39 = vor.u32 %v3696_v60, %v2966_v17  ;;  %v2812_v19 = vld [vmem:[%s5803_s0 + $0x150] sm:$0xf]  ;;  %v2820_v17 = vld [vmem:[%s5803_s0 + $0x158] sm:$0xf]  ;;  %v2822_v18 = vld [vmem:[%s5803_s0 + $0x178] sm:$0xf0] }
  0xea   :  { %v1267_v30 = vadd.f32 %v1266_v58, %v1217_v56  ;;  %v3661_v60 = vld [vmem:[%s5803_s0 + $0x174] sm:$0xf0]  ;;  %v5016_v34 = vor.u32 %v3660_v29, %v2812_v19  ;;  %v5018_v58 = vor.u32 %v3656_v32, %v2814_v33  ;;  %v3022_v19 = vld [vmem:[%s5804_s1 + $0x108] sm:$0xf0]  ;;  %v3726_v33 = vld [vmem:[%s5804_s1 + $0x184] sm:$0xf] }
  0xeb   :  { %v1362_v38 = vpop.f32.mrf.mxu3  ;;  %1633 = vmatpush.bf16.msra.mxu1 %v2969_v39  ;;  %v5020_v59 = vor.u32 %v3661_v60, %v2820_v17  ;;  %v5022_v39 = vor.u32 %v3657_v61, %v2822_v18  ;;  %v2894_v32 = vld [vmem:[%s5804_s1 + $0x8] sm:$0xf0] }
  0xec   :  { %v4984_v16 = vadd.f32 %v1362_v38, %v1314_v35  ;;  %5865 = vst [vmem:[#allocation26_spill] sm:$0xff] %v5016_v34  ;;  %v3086_v17 = vld [vmem:[%s5804_s1 + $0x188] sm:$0xf0] }
  0xed   :  { %5866 = vst [vmem:[#allocation27_spill] sm:$0xff] %v5018_v58  ;;  %v3089_v18 = vor.u32 %v3726_v33, %v3086_v17  ;;  %v2846_v33 = vld [vmem:[%s5803_s0 + $0x1b0] sm:$0xf0]  ;;  %v3665_v17 = vld [vmem:[%s5803_s0 + $0x19c] sm:$0xf] }
  0xee   :  { %5867 = vst [vmem:[#allocation28_spill] sm:$0xff] %v5020_v59 }
  0xef   :  { %5868 = vst [vmem:[#allocation29_spill] sm:$0xff] %v5022_v39  ;;  %1732 = vmatpush.bf16.msra.mxu3 %v3089_v18 }
  0xf0   :  { %v1315_v63 = vpop.f32.mrf.mxu2  ;;  %v1220_v56 = vpop.f32.mrf.mxu0 }
  0xf1   :  { %v1316_v35 = vadd.f32 %v1315_v63, %v1267_v30  ;;  %v1269_v36 = vpop.f32.mrf.mxu1  ;;  %v3710_v30 = vld [vmem:[%s5804_s1 + $0x104] sm:$0xf] }
  0xf2   :  { %v1270_v5 = vadd.f32 %v1269_v36, %v1220_v56  ;;  %v3678_v36 = vld [vmem:[%s5804_s1 + $0x4] sm:$0xf]  ;;  %v3025_v29 = vor.u32 %v3710_v30, %v3022_v19 }
  0xf3   :  { %v1364_v38 = vpop.f32.mrf.mxu3  ;;  %1415 = vmatmul.bf16.gmra.mxu0 %v5016_v34  ;;  %v2897_v61 = vor.u32 %v3678_v36, %v2894_v32  ;;  %v3664_v32 = vld [vmem:[%s5803_s0 + $0x194] sm:$0xf] }
  0xf4   :  { %v5024_v7 = vadd.f32 %v1364_v38, %v1316_v35  ;;  %1464 = vmatmul.bf16.gmra.mxu1 %v5018_v58  ;;  %1683 = vmatpush.bf16.msra.mxu2 %v3025_v29  ;;  %v3668_v29 = vld [vmem:[%s5803_s0 + $0x1ac] sm:$0xf0] }
  0xf5   :  { %1513 = vmatmul.bf16.gmra.mxu2 %v5020_v59  ;;  %1585 = vmatpush.bf16.msra.mxu0 %v2897_v61  ;;  %v2958_v59 = vld [vmem:[%s5804_s1 + $0x88] sm:$0xf0] }
  0xf8   :  { %1562 = vmatmul.bf16.gmra.mxu3 %v5022_v39  ;;  %v1318_v60 = vpop.f32.mrf.mxu2  ;;  %v1222_v38 = vpop.f32.mrf.mxu0  ;;  %v3694_v39 = vld [vmem:[%s5804_s1 + $0x84] sm:$0xf] }
  0xf9   :  { %v1319_v63 = vadd.f32 %v1318_v60, %v1270_v5  ;;  %v1271_v56 = vpop.f32.mrf.mxu1  ;;  %v2961_v36 = vor.u32 %v3694_v39, %v2958_v59  ;;  %v2844_v5 = vld [vmem:[%s5803_s0 + $0x190] sm:$0xf]  ;;  %v2852_v59 = vld [vmem:[%s5803_s0 + $0x198] sm:$0xf]  ;;  %v2854_v60 = vld [vmem:[%s5803_s0 + $0x1b8] sm:$0xf0] }
  0xfa   :  { %v1272_v19 = vadd.f32 %v1271_v56, %v1222_v38  ;;  %v3669_v39 = vld [vmem:[%s5803_s0 + $0x1b4] sm:$0xf0]  ;;  %v5080_v18 = vor.u32 %v3668_v29, %v2844_v5  ;;  %v5082_v56 = vor.u32 %v3664_v32, %v2846_v33  ;;  %v3334_v5 = vld [vmem:[%s5804_s1 + $0x378] sm:$0xf0]  ;;  %v3804_v33 = vld [vmem:[%s5804_s1 + $0x3f4] sm:$0xf] }
  0xfb   :  { %v1367_v35 = vpop.f32.mrf.mxu3  ;;  %1634 = vmatpush.bf16.msra.mxu1 %v2961_v36  ;;  %v5084_v58 = vor.u32 %v3669_v39, %v2852_v59  ;;  %v5086_v36 = vor.u32 %v3665_v17, %v2854_v60  ;;  %v3206_v32 = vld [vmem:[%s5804_s1 + $0x278] sm:$0xf0] }
  0xfc   :  { %v5048_v30 = vadd.f32 %v1367_v35, %v1319_v63  ;;  %5869 = vst [vmem:[#allocation30_spill] sm:$0xff] %v5080_v18  ;;  %v3398_v59 = vld [vmem:[%s5804_s1 + $0x3f8] sm:$0xf0] }
  0xfd   :  { %5870 = vst [vmem:[#allocation31_spill] sm:$0xff] %v5082_v56  ;;  %v3401_v60 = vor.u32 %v3804_v33, %v3398_v59  ;;  %v2878_v33 = vld [vmem:[%s5803_s0 + $0x1f0] sm:$0xf0]  ;;  %v3673_v59 = vld [vmem:[%s5803_s0 + $0x1dc] sm:$0xf] }
  0xfe   :  { %5871 = vst [vmem:[#allocation32_spill] sm:$0xff] %v5084_v58 }
  0xff   :  { %5872 = vst [vmem:[#allocation33_spill] sm:$0xff] %v5086_v36  ;;  %1921 = vmatpush.bf16.msrb.mxu3 %v3401_v60 }
 0x100   :  { %v1320_v61 = vpop.f32.mrf.mxu2  ;;  %v1225_v38 = vpop.f32.mrf.mxu0 }
 0x101   :  { %v1321_v63 = vadd.f32 %v1320_v61, %v1272_v19  ;;  %v1274_v34 = vpop.f32.mrf.mxu1  ;;  %v3788_v19 = vld [vmem:[%s5804_s1 + $0x374] sm:$0xf] }
 0x102   :  { %v1275_v2 = vadd.f32 %v1274_v34, %v1225_v38  ;;  %v3756_v34 = vld [vmem:[%s5804_s1 + $0x274] sm:$0xf]  ;;  %v3337_v29 = vor.u32 %v3788_v19, %v3334_v5 }
 0x103   :  { %v1369_v35 = vpop.f32.mrf.mxu3  ;;  %1420 = vmatmul.bf16.gmra.mxu0 %v5080_v18  ;;  %v3209_v17 = vor.u32 %v3756_v34, %v3206_v32  ;;  %v3672_v32 = vld [vmem:[%s5803_s0 + $0x1d4] sm:$0xf] }
 0x104   :  { %v5088_v3 = vadd.f32 %v1369_v35, %v1321_v63  ;;  %1469 = vmatmul.bf16.gmra.mxu1 %v5082_v56  ;;  %1872 = vmatpush.bf16.msrb.mxu2 %v3337_v29  ;;  %v3676_v29 = vld [vmem:[%s5803_s0 + $0x1ec] sm:$0xf0] }
 0x105   :  { %1518 = vmatmul.bf16.gmra.mxu2 %v5084_v58  ;;  %1774 = vmatpush.bf16.msrb.mxu0 %v3209_v17  ;;  %v3270_v58 = vld [vmem:[%s5804_s1 + $0x2f8] sm:$0xf0] }
 0x108   :  { %1567 = vmatmul.bf16.gmra.mxu3 %v5086_v36  ;;  %v1323_v39 = vpop.f32.mrf.mxu2  ;;  %v1227_v35 = vpop.f32.mrf.mxu0  ;;  %v3772_v36 = vld [vmem:[%s5804_s1 + $0x2f4] sm:$0xf] }
 0x109   :  { %v1324_v61 = vadd.f32 %v1323_v39, %v1275_v2  ;;  %v1276_v38 = vpop.f32.mrf.mxu1  ;;  %v3273_v34 = vor.u32 %v3772_v36, %v3270_v58  ;;  %v2876_v2 = vld [vmem:[%s5803_s0 + $0x1d0] sm:$0xf]  ;;  %v2884_v58 = vld [vmem:[%s5803_s0 + $0x1d8] sm:$0xf]  ;;  %v2886_v39 = vld [vmem:[%s5803_s0 + $0x1f8] sm:$0xf0] }
 0x10a   :  { %v1277_v5 = vadd.f32 %v1276_v38, %v1227_v35  ;;  %v3677_v36 = vld [vmem:[%s5803_s0 + $0x1f4] sm:$0xf0]  ;;  %v5144_v60 = vor.u32 %v3676_v29, %v2876_v2  ;;  %v5146_v38 = vor.u32 %v3672_v32, %v2878_v33  ;;  %v3326_v2 = vld [vmem:[%s5804_s1 + $0x368] sm:$0xf0]  ;;  %v3802_v33 = vld [vmem:[%s5804_s1 + $0x3e4] sm:$0xf] }
 0x10b   :  { %v1372_v63 = vpop.f32.mrf.mxu3  ;;  %1823 = vmatpush.bf16.msrb.mxu1 %v3273_v34  ;;  %v5148_v56 = vor.u32 %v3677_v36, %v2884_v58  ;;  %v5150_v34 = vor.u32 %v3673_v59, %v2886_v39  ;;  %v3198_v32 = vld [vmem:[%s5804_s1 + $0x268] sm:$0xf0] }
 0x10c   :  { %v5112_v19 = vadd.f32 %v1372_v63, %v1324_v61  ;;  %v3390_v58 = vld [vmem:[%s5804_s1 + $0x3e8] sm:$0xf0] }
 0x10d   :  { %5873 = vst [vmem:[#allocation34_spill] sm:$0xff] %v5148_v56  ;;  %v3393_v39 = vor.u32 %v3802_v33, %v3390_v58 }
 0x10e   :  { %5874 = vst [vmem:[#allocation35_spill] sm:$0xff] %v5150_v34 }
 0x10f   :  { %1922 = vmatpush.bf16.msrb.mxu3 %v3393_v39 }
 0x110   :  { %v1325_v17 = vpop.f32.mrf.mxu2  ;;  %v1230_v35 = vpop.f32.mrf.mxu0 }
 0x111   :  { %v1326_v61 = vadd.f32 %v1325_v17, %v1277_v5  ;;  %v1279_v18 = vpop.f32.mrf.mxu1  ;;  %v3786_v5 = vld [vmem:[%s5804_s1 + $0x364] sm:$0xf] }
 0x112   :  { %v1280_v23 = vadd.f32 %v1279_v18, %v1230_v35  ;;  %v3754_v18 = vld [vmem:[%s5804_s1 + $0x264] sm:$0xf]  ;;  %v3329_v29 = vor.u32 %v3786_v5, %v3326_v2 }
 0x113   :  { %v1374_v63 = vpop.f32.mrf.mxu3  ;;  %1425 = vmatmul.bf16.gmra.mxu0 %v5144_v60  ;;  %v3201_v59 = vor.u32 %v3754_v18, %v3198_v32 }
 0x114   :  { %v5152_v0 = vadd.f32 %v1374_v63, %v1326_v61  ;;  %1474 = vmatmul.bf16.gmra.mxu1 %v5146_v38  ;;  %1873 = vmatpush.bf16.msrb.mxu2 %v3329_v29 }
 0x115   :  { %1523 = vmatmul.bf16.gmra.mxu2 %v5148_v56  ;;  %1775 = vmatpush.bf16.msrb.mxu0 %v3201_v59  ;;  %v3262_v56 = vld [vmem:[%s5804_s1 + $0x2e8] sm:$0xf0] }
 0x118   :  { %1572 = vmatmul.bf16.gmra.mxu3 %v5150_v34  ;;  %v1328_v36 = vpop.f32.mrf.mxu2  ;;  %v1232_v63 = vpop.f32.mrf.mxu0  ;;  %v3770_v34 = vld [vmem:[%s5804_s1 + $0x2e4] sm:$0xf] }
 0x119   :  { %v1329_v17 = vadd.f32 %v1328_v36, %v1280_v23  ;;  %v1281_v35 = vpop.f32.mrf.mxu1  ;;  %v3265_v18 = vor.u32 %v3770_v34, %v3262_v56  ;;  %v3784_v56 = vld [vmem:[%s5804_s1 + $0x354] sm:$0xf] }
 0x11a   :  { %v1282_v2 = vadd.f32 %v1281_v35, %v1232_v63  ;;  %v3752_v34 = vld [vmem:[%s5804_s1 + $0x254] sm:$0xf] }
 0x11b   :  { %v1377_v61 = vpop.f32.mrf.mxu3  ;;  %1824 = vmatpush.bf16.msrb.mxu1 %v3265_v18 }
 0x11c   :  { %v5176_v5 = vadd.f32 %v1377_v61, %v1329_v17 }
 0x120   :  { %v1330_v23 = vpop.f32.mrf.mxu2  ;;  %v1391_v29 = vpop.f32.mrf.mxu0 }
 0x121   :  { %v1331_v32 = vadd.f32 %v1330_v23, %v1282_v2  ;;  %v1392_v58 = vadd.f32 %v1391_v29, %v4728_v37  ;;  %v1440_v36 = vpop.f32.mrf.mxu1  ;;  %v3318_v37 = vld [vmem:[%s5804_s1 + $0x358] sm:$0xf0] }
 0x122   :  { %v3321_v17 = vor.u32 %v3784_v56, %v3318_v37 }
 0x123   :  { %v1379_v33 = vpop.f32.mrf.mxu3  ;;  %v1441_v39 = vadd.f32 %v1440_v36, %v1392_v58  ;;  %1586 = vmatmul.bf16.vlgmr.msra.gmra.mxu0 %v4191_v48  ;;  %v3190_v48 = vld [vmem:[%s5804_s1 + $0x258] sm:$0xf0]  ;;  %v3768_v58 = vld [vmem:[%s5804_s1 + $0x2d4] sm:$0xf] }
 0x124   :  { %v5185_v59 = vadd.f32 %v1379_v33, %v1331_v32  ;;  %1635 = vmatmul.bf16.vlgmr.msra.gmra.mxu1 %v4202_v53  ;;  %v3800_v53 = vld [vmem:[%s5804_s1 + $0x3d4] sm:$0xf]  ;;  %v3193_v61 = vor.u32 %v3752_v34, %v3190_v48  ;;  %1874 = vmatpush.bf16.msrb.mxu2 %v3321_v17  ;;  %v3254_v36 = vld [vmem:[%s5804_s1 + $0x2d8] sm:$0xf0] }
 0x125   :  { %1684 = vmatmul.bf16.vlgmr.msra.gmra.mxu2 %v4204_v54  ;;  %v3382_v54 = vld [vmem:[%s5804_s1 + $0x3d8] sm:$0xf0] }
 0x126   :  { %v3385_v63 = vor.u32 %v3800_v53, %v3382_v54  ;;  %1776 = vmatpush.bf16.msrb.mxu0 %v3193_v61  ;;  %v3750_v61 = vld [vmem:[%s5804_s1 + $0x244] sm:$0xf] }
 0x128   :  { %1733 = vmatmul.bf16.vlgmr.msra.gmra.mxu3 %v4212_v57  ;;  %v1489_v57 = vpop.f32.mrf.mxu2  ;;  %v1393_v18 = vpop.f32.mrf.mxu0 }
 0x129   :  { %v1490_v35 = vadd.f32 %v1489_v57, %v1441_v39  ;;  %v1394_v23 = vadd.f32 %v1393_v18, %v4768_v31  ;;  %v1442_v32 = vpop.f32.mrf.mxu1  ;;  %1923 = vmatpush.bf16.msrb.mxu3 %v3385_v63  ;;  %v3257_v39 = vor.u32 %v3768_v58, %v3254_v36  ;;  %v3782_v57 = vld [vmem:[%s5804_s1 + $0x344] sm:$0xf] }
 0x12b   :  { %v1538_v2 = vpop.f32.mrf.mxu3  ;;  %v1443_v29 = vadd.f32 %v1442_v32, %v1394_v23  ;;  %1825 = vmatpush.bf16.msrb.mxu1 %v3257_v39 }
 0x12c   :  { %v5210_v33 = vadd.f32 %v1538_v2, %v1490_v35 }
 0x130   :  { %v1491_v56 = vpop.f32.mrf.mxu2  ;;  %v1396_v31 = vpop.f32.mrf.mxu0 }
 0x131   :  { %v1492_v37 = vadd.f32 %v1491_v56, %v1443_v29  ;;  %v1397_v17 = vadd.f32 %v1396_v31, %v4792_v1  ;;  %v1445_v48 = vpop.f32.mrf.mxu1  ;;  %v3310_v1 = vld [vmem:[%s5804_s1 + $0x348] sm:$0xf0]  ;;  %v3766_v56 = vld [vmem:[%s5804_s1 + $0x2c4] sm:$0xf] }
 0x132   :  { %v3313_v63 = vor.u32 %v3782_v57, %v3310_v1 }
 0x133   :  { %v1540_v34 = vpop.f32.mrf.mxu3  ;;  %v1446_v54 = vadd.f32 %v1445_v48, %v1397_v17  ;;  %1591 = vmatmul.bf16.gmra.mxu0 %v4278_v24  ;;  %v3182_v24 = vld [vmem:[%s5804_s1 + $0x248] sm:$0xf0] }
 0x134   :  { %v5219_v53 = vadd.f32 %v1540_v34, %v1492_v37  ;;  %1640 = vmatmul.bf16.gmra.mxu1 %v4280_v25  ;;  %v3798_v25 = vld [vmem:[%s5804_s1 + $0x3c4] sm:$0xf]  ;;  %v3185_v35 = vor.u32 %v3750_v61, %v3182_v24  ;;  %1875 = vmatpush.bf16.msrb.mxu2 %v3313_v63  ;;  %v3246_v37 = vld [vmem:[%s5804_s1 + $0x2c8] sm:$0xf0]  ;;  %v3780_v63 = vld [vmem:[%s5804_s1 + $0x334] sm:$0xf] }
 0x135   :  { %1689 = vmatmul.bf16.gmra.mxu2 %v4282_v26  ;;  %v3374_v26 = vld [vmem:[%s5804_s1 + $0x3c8] sm:$0xf0]  ;;  %v3249_v34 = vor.u32 %v3766_v56, %v3246_v37  ;;  %v3748_v24 = vld [vmem:[%s5804_s1 + $0x234] sm:$0xf] }
 0x136   :  { %v3377_v2 = vor.u32 %v3798_v25, %v3374_v26  ;;  %1777 = vmatpush.bf16.msrb.mxu0 %v3185_v35 }
 0x137   :  { %1826 = vmatpush.bf16.msrb.mxu1 %v3249_v34 }
 0x138   :  { %1738 = vmatmul.bf16.gmra.mxu3 %v4284_v27  ;;  %v1494_v27 = vpop.f32.mrf.mxu2  ;;  %v1398_v32 = vpop.f32.mrf.mxu0 }
 0x139   :  { %v1495_v18 = vadd.f32 %v1494_v27, %v1446_v54  ;;  %v1399_v29 = vadd.f32 %v1398_v32, %v4832_v6  ;;  %v1447_v58 = vpop.f32.mrf.mxu1  ;;  %1924 = vmatpush.bf16.msrb.mxu3 %v3377_v2 }
 0x13b   :  { %v1543_v23 = vpop.f32.mrf.mxu3  ;;  %v1448_v39 = vadd.f32 %v1447_v58, %v1399_v29  ;;  %v3764_v58 = vld [vmem:[%s5804_s1 + $0x2b4] sm:$0xf] }
 0x13c   :  { %v5244_v36 = vadd.f32 %v1543_v23, %v1495_v18 }
 0x140   :  { %v1496_v31 = vpop.f32.mrf.mxu2  ;;  %v1401_v6 = vpop.f32.mrf.mxu0 }
 0x141   :  { %v1497_v17 = vadd.f32 %v1496_v31, %v1448_v39  ;;  %v1402_v54 = vadd.f32 %v1401_v6, %v4856_v62  ;;  %v1450_v57 = vpop.f32.mrf.mxu1  ;;  %v3302_v62 = vld [vmem:[%s5804_s1 + $0x338] sm:$0xf0] }
 0x142   :  { %v3305_v25 = vor.u32 %v3780_v63, %v3302_v62  ;;  %v3238_v39 = vld [vmem:[%s5804_s1 + $0x2b8] sm:$0xf0]  ;;  %v3778_v62 = vld [vmem:[%s5804_s1 + $0x324] sm:$0xf] }
 0x143   :  { %v1545_v48 = vpop.f32.mrf.mxu3  ;;  %v1451_v61 = vadd.f32 %v1450_v57, %v1402_v54  ;;  %1596 = vmatmul.bf16.gmra.mxu0 %v4338_v49  ;;  %v3174_v49 = vld [vmem:[%s5804_s1 + $0x238] sm:$0xf0]  ;;  %v3241_v37 = vor.u32 %v3764_v58, %v3238_v39 }
 0x144   :  { %v5253_v1 = vadd.f32 %v1545_v48, %v1497_v17  ;;  %1645 = vmatmul.bf16.gmra.mxu1 %v4340_v50  ;;  %v3796_v50 = vld [vmem:[%s5804_s1 + $0x3b4] sm:$0xf]  ;;  %v3177_v26 = vor.u32 %v3748_v24, %v3174_v49  ;;  %1876 = vmatpush.bf16.msrb.mxu2 %v3305_v25 }
 0x145   :  { %1694 = vmatmul.bf16.gmra.mxu2 %v4342_v51  ;;  %v3366_v51 = vld [vmem:[%s5804_s1 + $0x3b8] sm:$0xf0]  ;;  %1827 = vmatpush.bf16.msrb.mxu1 %v3241_v37 }
 0x146   :  { %v3369_v27 = vor.u32 %v3796_v50, %v3366_v51  ;;  %1778 = vmatpush.bf16.msrb.mxu0 %v3177_v26 }
 0x148   :  { %1743 = vmatmul.bf16.gmra.mxu3 %v4344_v52  ;;  %v1499_v52 = vpop.f32.mrf.mxu2  ;;  %v1403_v18 = vpop.f32.mrf.mxu0 }
 0x149   :  { %v1500_v35 = vadd.f32 %v1499_v52, %v1451_v61  ;;  %v1404_v23 = vadd.f32 %v1403_v18, %v4896_v55  ;;  %v1452_v32 = vpop.f32.mrf.mxu1  ;;  %1925 = vmatpush.bf16.msrb.mxu3 %v3369_v27  ;;  %v3762_v18 = vld [vmem:[%s5804_s1 + $0x2a4] sm:$0xf] }
 0x14b   :  { %v1548_v2 = vpop.f32.mrf.mxu3  ;;  %v1453_v56 = vadd.f32 %v1452_v32, %v1404_v23  ;;  %v3230_v23 = vld [vmem:[%s5804_s1 + $0x2a8] sm:$0xf0] }
 0x14c   :  { %v5278_v29 = vadd.f32 %v1548_v2, %v1500_v35  ;;  %v3233_v58 = vor.u32 %v3762_v18, %v3230_v23 }
 0x14e   :  { %v1970_v34 = vmax.f32 %v5210_v33, %v5278_v29  ;;  %1828 = vmatpush.bf16.msrb.mxu1 %v3233_v58  ;;  %v3760_v58 = vld [vmem:[%s5804_s1 + $0x294] sm:$0xf]  ;;  %v5875_v29 = vld [vmem:[#allocation5_spill] sm:$0xff] }
 0x150   :  { %v1501_v55 = vpop.f32.mrf.mxu2  ;;  %v1406_v48 = vpop.f32.mrf.mxu0 }
 0x151   :  { %v1502_v31 = vadd.f32 %v1501_v55, %v1453_v56  ;;  %v1407_v6 = vadd.f32 %v1406_v48, %v4920_v4  ;;  %v1455_v54 = vpop.f32.mrf.mxu1  ;;  %v3294_v4 = vld [vmem:[%s5804_s1 + $0x328] sm:$0xf0] }
 0x152   :  { %v3297_v24 = vor.u32 %v3778_v62, %v3294_v4 }
 0x153   :  { %v1550_v17 = vpop.f32.mrf.mxu3  ;;  %v1456_v61 = vadd.f32 %v1455_v54, %v1407_v6  ;;  %1601 = vmatmul.bf16.gmra.mxu0 %v4398_v12  ;;  %v3746_v12 = vld [vmem:[%s5804_s1 + $0x224] sm:$0xf] }
 0x154   :  { %v5289_v57 = vadd.f32 %v1550_v17, %v1502_v31  ;;  %1650 = vmatmul.bf16.gmra.mxu1 %v4400_v13  ;;  %v3166_v13 = vld [vmem:[%s5804_s1 + $0x228] sm:$0xf0]  ;;  %1877 = vmatpush.bf16.msrb.mxu2 %v3297_v24 }
 0x155   :  { %1699 = vmatmul.bf16.gmra.mxu2 %v4402_v14  ;;  %v3794_v14 = vld [vmem:[%s5804_s1 + $0x3a4] sm:$0xf]  ;;  %v3169_v49 = vor.u32 %v3746_v12, %v3166_v13 }
 0x156   :  { %v1972_v63 = vmax.f32 %v5219_v53, %v5289_v57 }
 0x157   :  { %1779 = vmatpush.bf16.msrb.mxu0 %v3169_v49 }
 0x158   :  { %1748 = vmatmul.bf16.gmra.mxu3 %v4404_v15  ;;  %v3358_v15 = vld [vmem:[%s5804_s1 + $0x3a8] sm:$0xf0]  ;;  %v1504_v25 = vpop.f32.mrf.mxu2  ;;  %v1408_v26 = vpop.f32.mrf.mxu0 }
 0x159   :  { %v3361_v50 = vor.u32 %v3794_v14, %v3358_v15  ;;  %v1505_v51 = vadd.f32 %v1504_v25, %v1456_v61  ;;  %v1409_v27 = vadd.f32 %v1408_v26, %v4960_v28  ;;  %v1457_v35 = vpop.f32.mrf.mxu1  ;;  %v3776_v61 = vld [vmem:[%s5804_s1 + $0x314] sm:$0xf] }
 0x15b   :  { %v1553_v52 = vpop.f32.mrf.mxu3  ;;  %1926 = vmatpush.bf16.msrb.mxu3 %v3361_v50  ;;  %v1458_v32 = vadd.f32 %v1457_v35, %v1409_v27 }
 0x15c   :  { %v5316_v2 = vadd.f32 %v1553_v52, %v1505_v51 }
 0x15e   :  { %v1974_v39 = vmax.f32 %v5244_v36, %v5316_v2 }
 0x160   :  { %v1506_v28 = vpop.f32.mrf.mxu2  ;;  %v1411_v55 = vpop.f32.mrf.mxu0 }
 0x161   :  { %v1507_v56 = vadd.f32 %v1506_v28, %v1458_v32  ;;  %v1412_v31 = vadd.f32 %v1411_v55, %v4984_v16  ;;  %v1460_v17 = vpop.f32.mrf.mxu1  ;;  %v3286_v16 = vld [vmem:[%s5804_s1 + $0x318] sm:$0xf0] }
 0x162   :  { %v3289_v62 = vor.u32 %v3776_v61, %v3286_v16 }
 0x163   :  { %v1555_v37 = vpop.f32.mrf.mxu3  ;;  %v1461_v6 = vadd.f32 %v1460_v17, %v1412_v31  ;;  %1606 = vmatmul.bf16.gmra.mxu0 %v4458_v40  ;;  %v3744_v40 = vld [vmem:[%s5804_s1 + $0x214] sm:$0xf] }
 0x164   :  { %v5327_v48 = vadd.f32 %v1555_v37, %v1507_v56  ;;  %1655 = vmatmul.bf16.gmra.mxu1 %v4460_v41  ;;  %v3158_v41 = vld [vmem:[%s5804_s1 + $0x218] sm:$0xf0]  ;;  %1878 = vmatpush.bf16.msrb.mxu2 %v3289_v62  ;;  %v3342_v62 = vld [vmem:[%s5804_s1 + $0x388] sm:$0xf0] }
 0x165   :  { %1704 = vmatmul.bf16.gmra.mxu2 %v4462_v42  ;;  %v3792_v42 = vld [vmem:[%s5804_s1 + $0x394] sm:$0xf]  ;;  %v3161_v12 = vor.u32 %v3744_v40, %v3158_v41  ;;  %v3790_v40 = vld [vmem:[%s5804_s1 + $0x384] sm:$0xf] }
 0x166   :  { %v1976_v54 = vmax.f32 %v5253_v1, %v5327_v48 }
 0x167   :  { %1780 = vmatpush.bf16.msrb.mxu0 %v3161_v12  ;;  %v3214_v12 = vld [vmem:[%s5804_s1 + $0x288] sm:$0xf0] }
 0x168   :  { %1753 = vmatmul.bf16.gmra.mxu3 %v4464_v43  ;;  %v3350_v43 = vld [vmem:[%s5804_s1 + $0x398] sm:$0xf0]  ;;  %v1509_v4 = vpop.f32.mrf.mxu2  ;;  %v1413_v15 = vpop.f32.mrf.mxu0 }
 0x169   :  { %v3353_v24 = vor.u32 %v3792_v42, %v3350_v43  ;;  %v1510_v13 = vadd.f32 %v1509_v4, %v1461_v6  ;;  %v1414_v25 = vadd.f32 %v1413_v15, %v5024_v7  ;;  %v1462_v49 = vpop.f32.mrf.mxu1  ;;  %v3222_v7 = vld [vmem:[%s5804_s1 + $0x298] sm:$0xf0]  ;;  %v3345_v42 = vor.u32 %v3790_v40, %v3342_v62  ;;  %v3758_v4 = vld [vmem:[%s5804_s1 + $0x284] sm:$0xf] }
 0x16a   :  { %v3225_v56 = vor.u32 %v3760_v58, %v3222_v7  ;;  %v3217_v15 = vor.u32 %v3758_v4, %v3214_v12  ;;  %v5876_v4 = vld [vmem:[#allocation6_spill] sm:$0xff] }
 0x16b   :  { %v1558_v14 = vpop.f32.mrf.mxu3  ;;  %1927 = vmatpush.bf16.msrb.mxu3 %v3353_v24  ;;  %v1463_v51 = vadd.f32 %v1462_v49, %v1414_v25 }
 0x16c   :  { %v5354_v50 = vadd.f32 %v1558_v14, %v1510_v13  ;;  %1829 = vmatpush.bf16.msrb.mxu1 %v3225_v56 }
 0x16f   :  { %1928 = vmatpush.bf16.msrb.mxu3 %v3345_v42 }
 0x170   :  { %v1511_v52 = vpop.f32.mrf.mxu2  ;;  %v1416_v35 = vpop.f32.mrf.mxu0  ;;  %1830 = vmatpush.bf16.msrb.mxu1 %v3217_v15 }
 0x171   :  { %v1512_v26 = vadd.f32 %v1511_v52, %v1463_v51  ;;  %v1417_v18 = vadd.f32 %v1416_v35, %v5048_v30  ;;  %v1465_v23 = vpop.f32.mrf.mxu1 }
 0x173   :  { %v1560_v27 = vpop.f32.mrf.mxu3  ;;  %v1466_v28 = vadd.f32 %v1465_v23, %v1417_v18  ;;  %1611 = vmatmul.bf16.gmra.mxu0 %v4518_v8  ;;  %v3774_v8 = vld [vmem:[%s5804_s1 + $0x304] sm:$0xf] }
 0x174   :  { %v5357_v32 = vadd.f32 %v1560_v27, %v1512_v26  ;;  %1660 = vmatmul.bf16.gmra.mxu1 %v4520_v9  ;;  %v3278_v9 = vld [vmem:[%s5804_s1 + $0x308] sm:$0xf0] }
 0x175   :  { %1709 = vmatmul.bf16.gmra.mxu2 %v4522_v10  ;;  %v3742_v10 = vld [vmem:[%s5804_s1 + $0x204] sm:$0xf] }
 0x178   :  { %1758 = vmatmul.bf16.gmra.mxu3 %v4524_v11  ;;  %v1514_v30 = vpop.f32.mrf.mxu2  ;;  %v1418_v31 = vpop.f32.mrf.mxu0  ;;  %v3281_v11 = vor.u32 %v3774_v8, %v3278_v9 }
 0x179   :  { %v1515_v37 = vadd.f32 %v1514_v30, %v1466_v28  ;;  %v1419_v17 = vadd.f32 %v1418_v31, %v5088_v3  ;;  %v1467_v6 = vpop.f32.mrf.mxu1  ;;  %v3150_v3 = vld [vmem:[%s5804_s1 + $0x208] sm:$0xf0] }
 0x17a   :  { %v3153_v41 = vor.u32 %v3742_v10, %v3150_v3  ;;  %1879 = vmatpush.bf16.msrb.mxu2 %v3281_v11 }
 0x17b   :  { %v1563_v55 = vpop.f32.mrf.mxu3  ;;  %v1468_v16 = vadd.f32 %v1467_v6, %v1419_v17 }
 0x17c   :  { %v5370_v61 = vadd.f32 %v1563_v55, %v1515_v37  ;;  %1781 = vmatpush.bf16.msrb.mxu0 %v3153_v41 }
 0x180   :  { %v1516_v43 = vpop.f32.mrf.mxu2  ;;  %v1421_v14 = vpop.f32.mrf.mxu0 }
 0x181   :  { %v1517_v24 = vadd.f32 %v1516_v43, %v1468_v16  ;;  %v1422_v25 = vadd.f32 %v1421_v14, %v5112_v19  ;;  %v1470_v49 = vpop.f32.mrf.mxu1  ;;  %v5879_v14 = vld [vmem:[#allocation9_spill] sm:$0xff] }
 0x183   :  { %v1565_v13 = vpop.f32.mrf.mxu3  ;;  %v1471_v52 = vadd.f32 %v1470_v49, %v1422_v25  ;;  %1616 = vmatmul.bf16.gmra.mxu0 %v4578_v44 }
 0x184   :  { %v1566_v51 = vadd.f32 %v1565_v13, %v1517_v24  ;;  %1665 = vmatmul.bf16.gmra.mxu1 %v4580_v45  ;;  %v5409_v45 = vld [vmem:[%s5805_s2] sm:$0x3]  ;;  %v5877_v24 = vld [vmem:[#allocation7_spill] sm:$0xff] }
 0x185   :  { %1714 = vmatmul.bf16.gmra.mxu2 %v4582_v46  ;;  %v1996_v55 = vperm.slane %v5409_v45, 0  ;;  %v5878_v13 = vld [vmem:[#allocation8_spill] sm:$0xff] }
 0x188   :  { %1763 = vmatmul.bf16.gmra.mxu3 %v4584_v47  ;;  %v1519_v26 = vpop.f32.mrf.mxu2  ;;  %v1423_v18 = vpop.f32.mrf.mxu0 }
 0x189   :  { %v1520_v27 = vadd.f32 %v1519_v26, %v1471_v52  ;;  %v1424_v23 = vadd.f32 %v1423_v18, %v5152_v0  ;;  %v1472_v58 = vpop.f32.mrf.mxu1 }
 0x18b   :  { %v1568_v35 = vpop.f32.mrf.mxu3  ;;  %v1473_v7 = vadd.f32 %v1472_v58, %v1424_v23 }
 0x18c   :  { %v1569_v19 = vadd.f32 %v1568_v35, %v1520_v27 }
 0x18e   :  { %v1978_v28 = vmax.f32 %v5354_v50, %v1569_v19 }
 0x190   :  { %v1986_v44 = vmax.f32 %v1970_v34, %v1978_v28  ;;  %v1521_v46 = vpop.f32.mrf.mxu2  ;;  %v1426_v30 = vpop.f32.mrf.mxu0 }
 0x191   :  { %v1522_v47 = vadd.f32 %v1521_v46, %v1473_v7  ;;  %v1427_v0 = vadd.f32 %v1426_v30, %v5176_v5  ;;  %v1475_v37 = vpop.f32.mrf.mxu1  ;;  %v5882_v46 = vld [vmem:[#allocation12_spill] sm:$0xff] }
 0x192   :  { %v2000_v34 = vadd.f32 %v1996_v55, %v1986_v44  ;;  %v5881_v44 = vld [vmem:[#allocation11_spill] sm:$0xff] }
 0x193   :  { %v1570_v56 = vpop.f32.mrf.mxu3  ;;  %v1476_v50 = vadd.f32 %v1475_v37, %v1427_v0  ;;  %1621 = vmatmul.bf16.gmra.mxu0 %v4638_v20 }
 0x194   :  { %v1571_v31 = vadd.f32 %v1570_v56, %v1522_v47  ;;  %1670 = vmatmul.bf16.gmra.mxu1 %v4640_v21  ;;  %v5883_v47 = vld [vmem:[#allocation13_spill] sm:$0xff] }
 0x195   :  { %1719 = vmatmul.bf16.gmra.mxu2 %v4642_v22 }
 0x196   :  { %v1980_v33 = vmax.f32 %v5357_v32, %v1571_v31  ;;  %v2008_v32 = vmax.f32 %v2000_v34, 0.0 }
 0x198   :  { %1768 = vmatmul.bf16.gmra.mxu3 %v5875_v29  ;;  %v1988_v5 = vmax.f32 %v1972_v63, %v1980_v33  ;;  %v1524_v17 = vpop.f32.mrf.mxu2  ;;  %v1428_v9 = vpop.f32.mrf.mxu0 }
 0x199   :  { %v1525_v16 = vadd.f32 %v1524_v17, %v1476_v50  ;;  %v1429_v20 = vadd.f32 %v1428_v9, %v5185_v59  ;;  %v1477_v10 = vpop.f32.mrf.mxu1  ;;  %v5885_v9 = vld [vmem:[#allocation15_spill] sm:$0xff] }
 0x19a   :  { %v2002_v6 = vadd.f32 %v1996_v55, %v1988_v5 }
 0x19b   :  { %v1573_v8 = vpop.f32.mrf.mxu3  ;;  %v1478_v3 = vadd.f32 %v1477_v10, %v1429_v20  ;;  %v5886_v20 = vld [vmem:[#allocation16_spill] sm:$0xff]  ;;  %v5887_v10 = vld [vmem:[#allocation17_spill] sm:$0xff] }
 0x19c   :  { %v2010_v11 = vmax.f32 %v2002_v6, 0.0  ;;  %v1574_v21 = vadd.f32 %v1573_v8, %v1525_v16  ;;  %v5884_v8 = vld [vmem:[#allocation14_spill] sm:$0xff] }
 0x19e   :  { %v5422_v22 = vpack.c.bf16 %v2010_v11, %v2008_v32  ;;  %v1982_v40 = vmax.f32 %v5370_v61, %v1574_v21 }
 0x1a0   :  { %v1990_v53 = vmax.f32 %v1974_v39, %v1982_v40  ;;  %v1526_v57 = vpop.f32.mrf.mxu2  ;;  %v1587_v41 = vpop.f32.mrf.mxu0 }
 0x1a1   :  { %v1527_v63 = vadd.f32 %v1526_v57, %v1478_v3  ;;  %v1636_v42 = vpop.f32.mrf.mxu1 }
 0x1a2   :  { %v1637_v59 = vadd.f32 %v1636_v42, %v1587_v41  ;;  %v2004_v61 = vadd.f32 %v1996_v55, %v1990_v53 }
 0x1a3   :  { %v1575_v62 = vpop.f32.mrf.mxu3  ;;  %1782 = vmatmul.bf16.vlgmr.msrb.gmra.mxu0 %v5876_v4 }
 0x1a4   :  { %v1576_v43 = vadd.f32 %v1575_v62, %v1527_v63  ;;  %1831 = vmatmul.bf16.vlgmr.msrb.gmra.mxu1 %v5877_v24  ;;  %v2012_v26 = vmax.f32 %v2004_v61, 0.0  ;;  %v5889_v24 = vld [vmem:[#allocation19_spill] sm:$0xff] }
 0x1a5   :  { %1880 = vmatmul.bf16.vlgmr.msrb.gmra.mxu2 %v5878_v13  ;;  %v5890_v13 = vld [vmem:[#allocation20_spill] sm:$0xff] }
 0x1a6   :  { %v1984_v12 = vmax.f32 %v1566_v51, %v1576_v43 }
 0x1a8   :  { %1929 = vmatmul.bf16.vlgmr.msrb.gmra.mxu3 %v5879_v14  ;;  %v1992_v36 = vmax.f32 %v1976_v54, %v1984_v12  ;;  %v1685_v2 = vpop.f32.mrf.mxu2  ;;  %v1589_v49 = vpop.f32.mrf.mxu0  ;;  %v5880_v54 = vld [vmem:[#allocation10_spill] sm:$0xff]  ;;  %v5891_v14 = vld [vmem:[#allocation21_spill] sm:$0xff] }
 0x1a9   :  { %v1686_v15 = vadd.f32 %v1685_v2, %v1637_v59  ;;  %v1638_v52 = vpop.f32.mrf.mxu1  ;;  %v5888_v12 = vld [vmem:[#allocation18_spill] sm:$0xff] }
 0x1aa   :  { %v2006_v39 = vadd.f32 %v1996_v55, %v1992_v36  ;;  %v1639_v35 = vadd.f32 %v1638_v52, %v1589_v49 }
 0x1ab   :  { %v1734_v25 = vpop.f32.mrf.mxu3 }
 0x1ac   :  { %v2014_v27 = vmax.f32 %v2006_v39, 0.0  ;;  %v5435_v51 = vadd.f32 %v1734_v25, %v1686_v15 }
 0x1ae   :  { %v5437_v18 = vpack.c.bf16 %v2014_v27, %v2012_v26 }
 0x1b0   :  { %v1687_v23 = vpop.f32.mrf.mxu2  ;;  %v1592_v7 = vpop.f32.mrf.mxu0 }
 0x1b1   :  { %v1688_v58 = vadd.f32 %v1687_v23, %v1639_v35  ;;  %v1641_v28 = vpop.f32.mrf.mxu1 }
 0x1b2   :  { %v1642_v48 = vadd.f32 %v1641_v28, %v1592_v7  ;;  %v5892_v7 = vld [vmem:[#allocation22_spill] sm:$0xff]  ;;  %v5893_v28 = vld [vmem:[#allocation23_spill] sm:$0xff] }
 0x1b3   :  { %v1736_v19 = vpop.f32.mrf.mxu3  ;;  %1787 = vmatmul.bf16.gmra.mxu0 %v5880_v54  ;;  %v3813_v54 = vld [vmem:[%s5806_s3 + $0x38] sm:$0xff] }
 0x1b4   :  { %v5439_v1 = vadd.f32 %v1736_v19, %v1688_v58  ;;  %1836 = vmatmul.bf16.gmra.mxu1 %v5881_v44  ;;  %v5895_v44 = vld [vmem:[#allocation25_spill] sm:$0xff]  ;;  %2148 = vmatpush.bf16.msra.mxu0 %v3813_v54 }
 0x1b5   :  { %1885 = vmatmul.bf16.gmra.mxu2 %v5882_v46 }
 0x1b6   :  { %3854 = vmatpush.bf16.msra.mxu2 %v3813_v54 }
 0x1b8   :  { %1934 = vmatmul.bf16.gmra.mxu3 %v5883_v47  ;;  %v1690_v56 = vpop.f32.mrf.mxu2  ;;  %v1594_v37 = vpop.f32.mrf.mxu0 }
 0x1b9   :  { %v1691_v30 = vadd.f32 %v1690_v56, %v1642_v48  ;;  %v1643_v55 = vpop.f32.mrf.mxu1  ;;  %v5894_v48 = vld [vmem:[#allocation24_spill] sm:$0xff] }
 0x1ba   :  { %v1644_v50 = vadd.f32 %v1643_v55, %v1594_v37 }
 0x1bb   :  { %v1739_v0 = vpop.f32.mrf.mxu3 }
 0x1bc   :  { %v5445_v31 = vadd.f32 %v1739_v0, %v1691_v30  ;;  %v3812_v0 = vld [vmem:[%s5806_s3 + $0x30] sm:$0xff] }
 0x1bd   :  { %2149 = vmatpush.bf16.msra.mxu0 %v3812_v0  ;;  %3855 = vmatpush.bf16.msra.mxu2 %v3812_v0 }
 0x1c0   :  { %v1692_v33 = vpop.f32.mrf.mxu2  ;;  %v1597_v5 = vpop.f32.mrf.mxu0 }
 0x1c1   :  { %v1693_v29 = vadd.f32 %v1692_v33, %v1644_v50  ;;  %v1646_v17 = vpop.f32.mrf.mxu1  ;;  %v3811_v50 = vld [vmem:[%s5806_s3 + $0x28] sm:$0xff] }
 0x1c2   :  { %v1647_v16 = vadd.f32 %v1646_v17, %v1597_v5  ;;  %2150 = vmatpush.bf16.msra.mxu0 %v3811_v50  ;;  %3856 = vmatpush.bf16.msra.mxu2 %v3811_v50 }
 0x1c3   :  { %v1741_v34 = vpop.f32.mrf.mxu3  ;;  %1792 = vmatmul.bf16.gmra.mxu0 %v5884_v8 }
 0x1c4   :  { %v5447_v6 = vadd.f32 %v1741_v34, %v1693_v29  ;;  %1841 = vmatmul.bf16.gmra.mxu1 %v5885_v9 }
 0x1c5   :  { %1890 = vmatmul.bf16.gmra.mxu2 %v5886_v20  ;;  %v5896_v20 = vld [vmem:[#allocation26_spill] sm:$0xff] }
 0x1c8   :  { %1939 = vmatmul.bf16.gmra.mxu3 %v5887_v10  ;;  %v1695_v32 = vpop.f32.mrf.mxu2  ;;  %v1599_v3 = vpop.f32.mrf.mxu0  ;;  %v5897_v10 = vld [vmem:[#allocation27_spill] sm:$0xff] }
 0x1c9   :  { %v1696_v11 = vadd.f32 %v1695_v32, %v1647_v16  ;;  %v1648_v40 = vpop.f32.mrf.mxu1  ;;  %v3810_v16 = vld [vmem:[%s5806_s3 + $0x20] sm:$0xff] }
 0x1ca   :  { %v1649_v57 = vadd.f32 %v1648_v40, %v1599_v3  ;;  %2151 = vmatpush.bf16.msra.mxu0 %v3810_v16  ;;  %3857 = vmatpush.bf16.msra.mxu2 %v3810_v16  ;;  %v5898_v32 = vld [vmem:[#allocation28_spill] sm:$0xff] }
 0x1cb   :  { %v1744_v21 = vpop.f32.mrf.mxu3 }
 0x1cc   :  { %v5453_v53 = vadd.f32 %v1744_v21, %v1696_v11  ;;  %v3809_v11 = vld [vmem:[%s5806_s3 + $0x18] sm:$0xff]  ;;  %v5899_v21 = vld [vmem:[#allocation29_spill] sm:$0xff] }
 0x1ce   :  { %2152 = vmatpush.bf16.msra.mxu0 %v3809_v11  ;;  %3858 = vmatpush.bf16.msra.mxu2 %v3809_v11 }
 0x1d0   :  { %v1697_v63 = vpop.f32.mrf.mxu2  ;;  %v1602_v42 = vpop.f32.mrf.mxu0 }
 0x1d1   :  { %v1698_v62 = vadd.f32 %v1697_v63, %v1649_v57  ;;  %v1651_v43 = vpop.f32.mrf.mxu1 }
 0x1d2   :  { %v1652_v4 = vadd.f32 %v1651_v43, %v1602_v42  ;;  %v3807_v43 = vld [vmem:[%s5806_s3 + $0x8] sm:$0xff] }
 0x1d3   :  { %v1746_v41 = vpop.f32.mrf.mxu3  ;;  %1797 = vmatmul.bf16.gmra.mxu0 %v5888_v12 }
 0x1d4   :  { %v5455_v59 = vadd.f32 %v1746_v41, %v1698_v62  ;;  %1846 = vmatmul.bf16.gmra.mxu1 %v5889_v24  ;;  %v3808_v62 = vld [vmem:[%s5806_s3 + $0x10] sm:$0xff] }
 0x1d5   :  { %1895 = vmatmul.bf16.gmra.mxu2 %v5890_v13  ;;  %2153 = vmatpush.bf16.msra.mxu0 %v3808_v62  ;;  %v3806_v13 = vld [vmem:[%s5806_s3] sm:$0xff] }
 0x1d6   :  { %3859 = vmatpush.bf16.msra.mxu2 %v3808_v62 }
 0x1d8   :  { %1944 = vmatmul.bf16.gmra.mxu3 %v5891_v14  ;;  %v1700_v61 = vpop.f32.mrf.mxu2  ;;  %v1604_v39 = vpop.f32.mrf.mxu0 }
 0x1d9   :  { %v1701_v36 = vadd.f32 %v1700_v61, %v1652_v4  ;;  %v1653_v15 = vpop.f32.mrf.mxu1  ;;  %2154 = vmatpush.bf16.msra.mxu0 %v3807_v43 }
 0x1da   :  { %v1654_v49 = vadd.f32 %v1653_v15, %v1604_v39  ;;  %3860 = vmatpush.bf16.msra.mxu2 %v3807_v43  ;;  %v5902_v39 = vld [vmem:[#allocation32_spill] sm:$0xff]  ;;  %v5903_v15 = vld [vmem:[#allocation33_spill] sm:$0xff] }
 0x1db   :  { %v1749_v2 = vpop.f32.mrf.mxu3 }
 0x1dc   :  { %v5461_v25 = vadd.f32 %v1749_v2, %v1701_v36  ;;  %v5900_v36 = vld [vmem:[#allocation30_spill] sm:$0xff]  ;;  %v5901_v2 = vld [vmem:[#allocation31_spill] sm:$0xff] }
 0x1dd   :  { %2155 = vmatpush.bf16.msra.mxu0 %v3806_v13 }
 0x1de   :  { %3861 = vmatpush.bf16.msra.mxu2 %v3806_v13 }
 0x1e0   :  { %v1702_v52 = vpop.f32.mrf.mxu2  ;;  %v1607_v35 = vpop.f32.mrf.mxu0 }
 0x1e1   :  { %v1703_v26 = vadd.f32 %v1702_v52, %v1654_v49  ;;  %v1656_v23 = vpop.f32.mrf.mxu1 }
 0x1e2   :  { %v1657_v19 = vadd.f32 %v1656_v23, %v1607_v35 }
 0x1e3   :  { %v1751_v27 = vpop.f32.mrf.mxu3  ;;  %1802 = vmatmul.bf16.gmra.mxu0 %v5892_v7 }
 0x1e4   :  { %v5463_v58 = vadd.f32 %v1751_v27, %v1703_v26  ;;  %1851 = vmatmul.bf16.gmra.mxu1 %v5893_v28 }
 0x1e5   :  { %1900 = vmatmul.bf16.gmra.mxu2 %v5894_v48 }
 0x1e8   :  { %1949 = vmatmul.bf16.gmra.mxu3 %v5895_v44  ;;  %v1705_v46 = vpop.f32.mrf.mxu2  ;;  %v1609_v30 = vpop.f32.mrf.mxu0 }
 0x1e9   :  { %v1706_v47 = vadd.f32 %v1705_v46, %v1657_v19  ;;  %v1658_v37 = vpop.f32.mrf.mxu1  ;;  %v3821_v19 = vld [vmem:[%s5806_s3 + $0x78] sm:$0xff]  ;;  %v5904_v46 = vld [vmem:[#allocation34_spill] sm:$0xff] }
 0x1ea   :  { %v1659_v33 = vadd.f32 %v1658_v37, %v1609_v30  ;;  %3862 = vmatpush.bf16.msra.mxu3 %v3821_v19  ;;  %2167 = vmatpush.bf16.msra.mxu1 %v3821_v19 }
 0x1eb   :  { %v1754_v56 = vpop.f32.mrf.mxu3 }
 0x1ec   :  { %v5475_v55 = vadd.f32 %v1754_v56, %v1706_v47  ;;  %v5905_v47 = vld [vmem:[#allocation35_spill] sm:$0xff] }
 0x1f0   :  { %v1707_v29 = vpop.f32.mrf.mxu2  ;;  %v1612_v17 = vpop.f32.mrf.mxu0 }
 0x1f1   :  { %v5480_v34 = vadd.f32 %v1707_v29, %v1659_v33  ;;  %v1661_v8 = vpop.f32.mrf.mxu1 }
 0x1f2   :  { %v1662_v9 = vadd.f32 %v1661_v8, %v1612_v17  ;;  %v3820_v17 = vld [vmem:[%s5806_s3 + $0x70] sm:$0xff] }
 0x1f3   :  { %v5482_v5 = vpop.f32.mrf.mxu3  ;;  %1807 = vmatmul.bf16.gmra.mxu0 %v5896_v20  ;;  %3863 = vmatpush.bf16.msra.mxu3 %v3820_v17 }
 0x1f4   :  { %1856 = vmatmul.bf16.gmra.mxu1 %v5897_v10 }
 0x1f5   :  { %1905 = vmatmul.bf16.gmra.mxu2 %v5898_v32  ;;  %2168 = vmatpush.bf16.msra.mxu1 %v3820_v17 }
 0x1f8   :  { %1954 = vmatmul.bf16.gmra.mxu3 %v5899_v21  ;;  %v1710_v3 = vpop.f32.mrf.mxu2  ;;  %v5494_v63 = vpop.f32.mrf.mxu0 }
 0x1f9   :  { %v1711_v40 = vadd.f32 %v1710_v3, %v1662_v9  ;;  %v5499_v41 = vpop.f32.mrf.mxu1 }
 0x1fb   :  { %v1759_v57 = vpop.f32.mrf.mxu3 }
 0x1fc   :  { %v5501_v42 = vadd.f32 %v1759_v57, %v1711_v40 }
 0x200   :  { %v5506_v4 = vpop.f32.mrf.mxu2  ;;  %v1617_v24 = vpop.f32.mrf.mxu0 }
 0x201   :  { %v1666_v14 = vpop.f32.mrf.mxu1 }
 0x202   :  { %v1667_v61 = vadd.f32 %v1666_v14, %v1617_v24 }
 0x203   :  { %v5508_v12 = vpop.f32.mrf.mxu3  ;;  %1812 = vmatmul.bf16.gmra.mxu0 %v5900_v36 }
 0x204   :  { %1861 = vmatmul.bf16.gmra.mxu1 %v5901_v2 }
 0x205   :  { %1910 = vmatmul.bf16.gmra.mxu2 %v5902_v39 }
 0x208   :  { %1959 = vmatmul.bf16.gmra.mxu3 %v5903_v15  ;;  %v1715_v49 = vpop.f32.mrf.mxu2  ;;  %v5517_v27 = vpop.f32.mrf.mxu0 }
 0x209   :  { %v1716_v52 = vadd.f32 %v1715_v49, %v1667_v61  ;;  %v5519_v35 = vpop.f32.mrf.mxu1 }
 0x20b   :  { %v1764_v26 = vpop.f32.mrf.mxu3 }
 0x20c   :  { %v5521_v23 = vadd.f32 %v1764_v26, %v1716_v52 }
 0x210   :  { %v5526_v7 = vpop.f32.mrf.mxu2  ;;  %v1622_v48 = vpop.f32.mrf.mxu0 }
 0x211   :  { %v1671_v54 = vpop.f32.mrf.mxu1 }
 0x212   :  { %v1672_v44 = vadd.f32 %v1671_v54, %v1622_v48  ;;  %v3818_v48 = vld [vmem:[%s5806_s3 + $0x60] sm:$0xff] }
 0x213   :  { %v5528_v28 = vpop.f32.mrf.mxu3  ;;  %1817 = vmatmul.bf16.gmra.mxu0 %v5144_v60 }
 0x214   :  { %1866 = vmatmul.bf16.gmra.mxu1 %v5146_v38 }
 0x215   :  { %1915 = vmatmul.bf16.gmra.mxu2 %v5904_v46 }
 0x218   :  { %1964 = vmatmul.bf16.gmra.mxu3 %v5905_v47  ;;  %v1720_v56 = vpop.f32.mrf.mxu2  ;;  %v1624_v37 = vpop.f32.mrf.mxu0 }
 0x219   :  { %v1721_v30 = vadd.f32 %v1720_v56, %v1672_v44  ;;  %v1673_v50 = vpop.f32.mrf.mxu1 }
 0x21a   :  { %v5536_v29 = vadd.f32 %v1673_v50, %v1624_v37 }
 0x21b   :  { %v1769_v0 = vpop.f32.mrf.mxu3 }
 0x21c   :  { %v5534_v33 = vadd.f32 %v1769_v0, %v1721_v30 }
 0x220   :  { %v5541_v60 = vpop.f32.mrf.mxu2  ;;  %v1783_v16 = vpop.f32.mrf.mxu0 }
 0x221   :  { %v1784_v8 = vadd.f32 %v1783_v16, %v5435_v51  ;;  %v1832_v9 = vpop.f32.mrf.mxu1  ;;  %v3819_v51 = vld [vmem:[%s5806_s3 + $0x68] sm:$0xff] }
 0x222   :  { %3864 = vmatpush.bf16.msra.mxu3 %v3819_v51  ;;  %2169 = vmatpush.bf16.msra.mxu1 %v3819_v51 }
 0x223   :  { %v5543_v38 = vpop.f32.mrf.mxu3  ;;  %v1833_v20 = vadd.f32 %v1832_v9, %v1784_v8  ;;  %2156 = vmatmul.bf16.vlgmr.msra.gmra.mxu0 %v5422_v22 }
 0x225   :  { %2161 = vmatmul.bf16.vlgmr.msra.gmra.mxu2 %v5437_v18 }
 0x226   :  { %3865 = vmatpush.bf16.msra.mxu3 %v3818_v48  ;;  %2170 = vmatpush.bf16.msra.mxu1 %v3818_v48 }
 0x228   :  { %v1881_v10 = vpop.f32.mrf.mxu2  ;;  %v1785_v21 = vpop.f32.mrf.mxu0 }
 0x229   :  { %v1882_v32 = vadd.f32 %v1881_v10, %v1833_v20  ;;  %v1786_v3 = vadd.f32 %v1785_v21, %v5439_v1  ;;  %v1834_v40 = vpop.f32.mrf.mxu1  ;;  %v3817_v10 = vld [vmem:[%s5806_s3 + $0x58] sm:$0xff] }
 0x22a   :  { %3866 = vmatpush.bf16.msra.mxu3 %v3817_v10  ;;  %2171 = vmatpush.bf16.msra.mxu1 %v3817_v10  ;;  %v3814_v10 = vld [vmem:[%s5806_s3 + $0x40] sm:$0xff] }
 0x22b   :  { %v1930_v11 = vpop.f32.mrf.mxu3  ;;  %v1835_v62 = vadd.f32 %v1834_v40, %v1786_v3 }
 0x22c   :  { %v5549_v57 = vadd.f32 %v1930_v11, %v1882_v32 }
 0x230   :  { %v1883_v43 = vpop.f32.mrf.mxu2  ;;  %v1788_v18 = vpop.f32.mrf.mxu0 }
 0x231   :  { %v1884_v22 = vadd.f32 %v1883_v43, %v1835_v62  ;;  %v1789_v13 = vadd.f32 %v1788_v18, %v5445_v31  ;;  %v1837_v14 = vpop.f32.mrf.mxu1 }
 0x233   :  { %v1932_v24 = vpop.f32.mrf.mxu3  ;;  %v1838_v1 = vadd.f32 %v1837_v14, %v1789_v13 }
 0x234   :  { %v5555_v61 = vadd.f32 %v1932_v24, %v1884_v22 }
 0x238   :  { %v1886_v36 = vpop.f32.mrf.mxu2  ;;  %v1790_v15 = vpop.f32.mrf.mxu0 }
 0x239   :  { %v1887_v2 = vadd.f32 %v1886_v36, %v1838_v1  ;;  %v1791_v49 = vadd.f32 %v1790_v15, %v5447_v6  ;;  %v1839_v52 = vpop.f32.mrf.mxu1 }
 0x23b   :  { %v1935_v39 = vpop.f32.mrf.mxu3  ;;  %v1840_v19 = vadd.f32 %v1839_v52, %v1791_v49 }
 0x23c   :  { %v5558_v26 = vadd.f32 %v1935_v39, %v1887_v2 }
 0x240   :  { %v1888_v31 = vpop.f32.mrf.mxu2  ;;  %v1793_v46 = vpop.f32.mrf.mxu0 }
 0x241   :  { %v1889_v54 = vadd.f32 %v1888_v31, %v1840_v19  ;;  %v1794_v47 = vadd.f32 %v1793_v46, %v5453_v53  ;;  %v1842_v56 = vpop.f32.mrf.mxu1 }
 0x243   :  { %v1937_v44 = vpop.f32.mrf.mxu3  ;;  %v1843_v6 = vadd.f32 %v1842_v56, %v1794_v47 }
 0x244   :  { %v5564_v30 = vadd.f32 %v1937_v44, %v1889_v54 }
 0x248   :  { %v1891_v0 = vpop.f32.mrf.mxu2  ;;  %v1795_v17 = vpop.f32.mrf.mxu0 }
 0x249   :  { %v1892_v37 = vadd.f32 %v1891_v0, %v1843_v6  ;;  %v1796_v16 = vadd.f32 %v1795_v17, %v5455_v59  ;;  %v1844_v8 = vpop.f32.mrf.mxu1 }
 0x24b   :  { %v1940_v50 = vpop.f32.mrf.mxu3  ;;  %v1845_v20 = vadd.f32 %v1844_v8, %v1796_v16 }
 0x24c   :  { %v5567_v9 = vadd.f32 %v1940_v50, %v1892_v37  ;;  %v3815_v50 = vld [vmem:[%s5806_s3 + $0x48] sm:$0xff] }
 0x24e   :  { %v1971_v53 = vmax.f32 %v5549_v57, %v5567_v9 }
 0x250   :  { %v1893_v32 = vpop.f32.mrf.mxu2  ;;  %v1798_v3 = vpop.f32.mrf.mxu0 }
 0x251   :  { %v1894_v11 = vadd.f32 %v1893_v32, %v1845_v20  ;;  %v1799_v40 = vadd.f32 %v1798_v3, %v5461_v25  ;;  %v1847_v59 = vpop.f32.mrf.mxu1  ;;  %v3816_v25 = vld [vmem:[%s5806_s3 + $0x50] sm:$0xff] }
 0x252   :  { %3867 = vmatpush.bf16.msra.mxu3 %v3816_v25  ;;  %2172 = vmatpush.bf16.msra.mxu1 %v3816_v25 }
 0x253   :  { %v1942_v21 = vpop.f32.mrf.mxu3  ;;  %v1848_v51 = vadd.f32 %v1847_v59, %v1799_v40  ;;  %v1669_v59 = vadd.f32 %v5519_v35, %v5517_v27 }
 0x254   :  { %v5575_v62 = vadd.f32 %v1942_v21, %v1894_v11 }
 0x256   :  { %v1973_v43 = vmax.f32 %v5555_v61, %v5575_v62  ;;  %3868 = vmatpush.bf16.msra.mxu3 %v3815_v50  ;;  %2173 = vmatpush.bf16.msra.mxu1 %v3815_v50 }
 0x258   :  { %v1896_v22 = vpop.f32.mrf.mxu2  ;;  %v1800_v13 = vpop.f32.mrf.mxu0 }
 0x259   :  { %v1897_v24 = vadd.f32 %v1896_v22, %v1848_v51  ;;  %v1801_v14 = vadd.f32 %v1800_v13, %v5463_v58  ;;  %v1849_v1 = vpop.f32.mrf.mxu1  ;;  %v1718_v22 = vadd.f32 %v5526_v7, %v1669_v59 }
 0x25a   :  { %2174 = vmatpush.bf16.msra.mxu1 %v3814_v10  ;;  %3869 = vmatpush.bf16.msra.mxu3 %v3814_v10 }
 0x25b   :  { %v1945_v18 = vpop.f32.mrf.mxu3  ;;  %v1850_v2 = vadd.f32 %v1849_v1, %v1801_v14 }
 0x25c   :  { %v5580_v36 = vadd.f32 %v1945_v18, %v1897_v24  ;;  %v1757_v18 = vadd.f32 %v5482_v5, %v5480_v34 }
 0x25e   :  { %v1975_v39 = vmax.f32 %v5558_v26, %v5580_v36  ;;  %v3480_v26 = vld [vmem:[%s5808_s5 + $0x30] sm:$0xf]  ;;  %v3829_v36 = vld [vmem:[%s5808_s5 + $0x34] sm:$0xf0] }
 0x260   :  { %v1898_v15 = vpop.f32.mrf.mxu2  ;;  %v1803_v19 = vpop.f32.mrf.mxu0 }
 0x261   :  { %v1899_v49 = vadd.f32 %v1898_v15, %v1850_v2  ;;  %v1852_v48 = vpop.f32.mrf.mxu1  ;;  %v1804_v11 = vadd.f32 %v1803_v19, %v5475_v55  ;;  %v1767_v55 = vadd.f32 %v5528_v28, %v1718_v22 }
 0x263   :  { %v1947_v52 = vpop.f32.mrf.mxu3  ;;  %v1853_v24 = vadd.f32 %v1852_v48, %v1804_v11  ;;  %v1664_v48 = vadd.f32 %v5499_v41, %v5494_v63 }
 0x264   :  { %v5587_v31 = vadd.f32 %v1947_v52, %v1899_v49 }
 0x266   :  { %v1977_v58 = vmax.f32 %v5564_v30, %v5587_v31  ;;  %v3482_v30 = vld [vmem:[%s5808_s5 + $0x38] sm:$0xf0]  ;;  %v3520_v31 = vld [vmem:[%s5808_s5 + $0x50] sm:$0xf] }
 0x268   :  { %v1901_v54 = vpop.f32.mrf.mxu2  ;;  %v1805_v46 = vpop.f32.mrf.mxu0 }
 0x269   :  { %v1854_v47 = vpop.f32.mrf.mxu1  ;;  %v1902_v13 = vadd.f32 %v1901_v54, %v1853_v24  ;;  %v1806_v2 = vadd.f32 %v1805_v46, %v1757_v18 }
 0x26b   :  { %v1950_v44 = vpop.f32.mrf.mxu3 }
 0x26c   :  { %v1951_v19 = vadd.f32 %v1950_v44, %v1902_v13  ;;  %v1713_v44 = vadd.f32 %v5506_v4, %v1664_v48  ;;  %v3827_v48 = vld [vmem:[%s5808_s5 + $0x24] sm:$0xf0] }
 0x270   :  { %v1903_v56 = vpop.f32.mrf.mxu2  ;;  %v1808_v0 = vpop.f32.mrf.mxu0 }
 0x271   :  { %v1857_v37 = vpop.f32.mrf.mxu1  ;;  %v1809_v28 = vadd.f32 %v1808_v0, %v5501_v42  ;;  %v1762_v42 = vadd.f32 %v5508_v12, %v1713_v44 }
 0x273   :  { %v1952_v6 = vpop.f32.mrf.mxu3  ;;  %v1858_v57 = vadd.f32 %v1857_v37, %v1809_v28  ;;  %v3826_v28 = vld [vmem:[%s5808_s5 + $0x24] sm:$0xf] }
 0x278   :  { %v1906_v17 = vpop.f32.mrf.mxu2  ;;  %v1810_v8 = vpop.f32.mrf.mxu0 }
 0x279   :  { %v5594_v20 = vpop.f32.mrf.mxu1  ;;  %v1907_v41 = vadd.f32 %v1906_v17, %v1858_v57 }
 0x27b   :  { %v1955_v16 = vpop.f32.mrf.mxu3 }
 0x27c   :  { %v1956_v18 = vadd.f32 %v1955_v16, %v1907_v41 }
 0x280   :  { %v5599_v32 = vpop.f32.mrf.mxu2  ;;  %v1813_v3 = vpop.f32.mrf.mxu0 }
 0x281   :  { %v1862_v40 = vpop.f32.mrf.mxu1  ;;  %v1814_v51 = vadd.f32 %v1813_v3, %v5521_v23  ;;  %v1855_v23 = vadd.f32 %v1854_v47, %v1806_v2  ;;  %v1997_v47 = vperm.slane %v5409_v45, 1 }
 0x283   :  { %v5602_v21 = vpop.f32.mrf.mxu3  ;;  %v1863_v14 = vadd.f32 %v1862_v40, %v1814_v51  ;;  %v1904_v7 = vadd.f32 %v1903_v56, %v1855_v23  ;;  %v1811_v51 = vadd.f32 %v1810_v8, %v1762_v42  ;;  %v3824_v42 = vld [vmem:[%s5808_s5 + $0x14] sm:$0xf] }
 0x285   :  { %v1953_v3 = vadd.f32 %v1952_v6, %v1904_v7  ;;  %v1860_v12 = vadd.f32 %v5594_v20, %v1811_v51  ;;  %v3522_v7 = vld [vmem:[%s5808_s5 + $0x58] sm:$0xf0]  ;;  %v3492_v51 = vld [vmem:[%s5808_s5 + $0x8] sm:$0xf0] }
 0x287   :  { %v1909_v62 = vadd.f32 %v5599_v32, %v1860_v12 }
 0x288   :  { %v1911_v1 = vpop.f32.mrf.mxu2  ;;  %v1815_v49 = vpop.f32.mrf.mxu0 }
 0x289   :  { %v1912_v25 = vadd.f32 %v1911_v1, %v1863_v14  ;;  %v1864_v52 = vpop.f32.mrf.mxu1  ;;  %v1816_v35 = vadd.f32 %v1815_v49, %v1767_v55  ;;  %v1958_v2 = vadd.f32 %v5602_v21, %v1909_v62  ;;  %v3481_v21 = vor.u32 %v3829_v36, %v3480_v26  ;;  %v3534_v36 = vld [vmem:[%s5808_s5 + $0x60] sm:$0xf] }
 0x28b   :  { %v1960_v15 = vpop.f32.mrf.mxu3  ;;  %v1865_v5 = vadd.f32 %v1864_v52, %v1816_v35  ;;  %2239 = vmatpush.bf16.msrb.mxu2 %v3481_v21  ;;  %v3834_v21 = vld [vmem:[%s5808_s5 + $0x64] sm:$0xf] }
 0x28c   :  { %v1961_v27 = vadd.f32 %v1960_v15, %v1912_v25 }
 0x28e   :  { %v1979_v50 = vmax.f32 %v1951_v19, %v1961_v27 }
 0x290   :  { %v1987_v34 = vmax.f32 %v1971_v53, %v1979_v50  ;;  %v1913_v54 = vpop.f32.mrf.mxu2  ;;  %v1818_v11 = vpop.f32.mrf.mxu0  ;;  %v1723_v53 = vadd.f32 %v5541_v60, %v5536_v29  ;;  %v3832_v50 = vld [vmem:[%s5808_s5 + $0x54] sm:$0xf] }
 0x291   :  { %v1914_v46 = vadd.f32 %v1913_v54, %v1865_v5  ;;  %v1819_v40 = vadd.f32 %v1818_v11, %v5534_v33  ;;  %v1867_v9 = vpop.f32.mrf.mxu1  ;;  %v3472_v5 = vld [vmem:[%s5808_s5 + $0x20] sm:$0xf]  ;;  %v3831_v11 = vld [vmem:[%s5808_s5 + $0x44] sm:$0xf0] }
 0x292   :  { %v2001_v0 = vadd.f32 %v1997_v47, %v1987_v34  ;;  %v1772_v45 = vadd.f32 %v5543_v38, %v1723_v53  ;;  %v3525_v34 = vor.u32 %v3832_v50, %v3522_v7  ;;  %v3473_v54 = vor.u32 %v3827_v48, %v3472_v5  ;;  %v3825_v53 = vld [vmem:[%s5808_s5 + $0x14] sm:$0xf0]  ;;  %v3844_v7 = vld [vmem:[%s5810_s7 + $0x30] sm:$0xff]  ;;  %v3843_v5 = vld [vmem:[%s5810_s7 + $0x28] sm:$0xff] }
 0x293   :  { %v1962_v10 = vpop.f32.mrf.mxu3  ;;  %v1868_v6 = vadd.f32 %v1867_v9, %v1819_v40  ;;  %v3498_v9 = vld [vmem:[%s5808_s5 + $0x10] sm:$0xf]  ;;  %v3853_v50 = vld [vmem:[%s5810_s7 + $0x78] sm:$0xff]  ;;  %v3851_v48 = vld [vmem:[%s5810_s7 + $0x68] sm:$0xff] }
 0x294   :  { %v1963_v56 = vadd.f32 %v1962_v10, %v1914_v46  ;;  %v2009_v29 = vmax.f32 %v2001_v0, 0.0  ;;  %2356 = vmatpush.bf16.msrb.mxu1 %v3525_v34  ;;  %v3474_v46 = vld [vmem:[%s5808_s5 + $0x28] sm:$0xf0]  ;;  %v3512_v10 = vld [vmem:[%s5808_s5 + $0x40] sm:$0xf]  ;;  %2240 = vmatpush.bf16.msrb.mxu2 %v3473_v54  ;;  %v3499_v41 = vor.u32 %v3825_v53, %v3498_v9  ;;  %v3852_v34 = vld [vmem:[%s5810_s7 + $0x70] sm:$0xff] }
 0x295   :  { %v3477_v44 = vor.u32 %v3826_v28, %v3474_v46  ;;  %v3500_v0 = vld [vmem:[%s5808_s5 + $0x18] sm:$0xf0]  ;;  %v3842_v28 = vld [vmem:[%s5810_s7 + $0x20] sm:$0xff]  ;;  %v3847_v9 = vld [vmem:[%s5810_s7 + $0x48] sm:$0xff] }
 0x296   :  { %v1981_v63 = vmax.f32 %v1953_v3, %v1963_v56  ;;  %v3513_v3 = vor.u32 %v3831_v11, %v3512_v10  ;;  %v3514_v56 = vld [vmem:[%s5808_s5 + $0x48] sm:$0xf0]  ;;  %v3850_v54 = vld [vmem:[%s5810_s7 + $0x60] sm:$0xff]  ;;  %v3841_v46 = vld [vmem:[%s5810_s7 + $0x18] sm:$0xff] }
 0x297   :  { %v3849_v10 = vld [vmem:[%s5810_s7 + $0x58] sm:$0xff] }
 0x298   :  { %v1989_v4 = vmax.f32 %v1973_v43, %v1981_v63  ;;  %v1916_v59 = vpop.f32.mrf.mxu2  ;;  %v1820_v24 = vpop.f32.mrf.mxu0  ;;  %2288 = vmatpush.bf16.msra.mxu2 %v3499_v41  ;;  %v3838_v41 = vld [vmem:[%s5810_s7] sm:$0xff] }
 0x299   :  { %v1917_v37 = vadd.f32 %v1916_v59, %v1868_v6  ;;  %v1821_v13 = vadd.f32 %v1820_v24, %v1772_v45  ;;  %v1869_v61 = vpop.f32.mrf.mxu1  ;;  %v3503_v6 = vor.u32 %v3824_v42, %v3500_v0  ;;  %v3823_v59 = vld [vmem:[%s5808_s5 + $0x4] sm:$0xf0]  ;;  %v3822_v45 = vld [vmem:[%s5808_s5 + $0x4] sm:$0xf] }
 0x29a   :  { %v2003_v33 = vadd.f32 %v1997_v47, %v1989_v4  ;;  %v3490_v4 = vld [vmem:[%s5808_s5] sm:$0xf] }
 0x29b   :  { %v1965_v22 = vpop.f32.mrf.mxu3  ;;  %v1870_v43 = vadd.f32 %v1869_v61, %v1821_v13  ;;  %v3846_v42 = vld [vmem:[%s5810_s7 + $0x40] sm:$0xff] }
 0x29c   :  { %v2011_v60 = vmax.f32 %v2003_v33, 0.0  ;;  %v1966_v17 = vadd.f32 %v1965_v22, %v1917_v37  ;;  %v3491_v37 = vor.u32 %v3823_v59, %v3490_v4  ;;  %v3495_v22 = vor.u32 %v3822_v45, %v3492_v51 }
 0x29e   :  { %v2017_v14 = vpack.c.bf16 %v2011_v60, %v2009_v29  ;;  %v1983_v1 = vmax.f32 %v1956_v18, %v1966_v17  ;;  %2289 = vmatpush.bf16.msra.mxu2 %v3491_v37 }
 0x2a0   :  { %v1991_v38 = vmax.f32 %v1975_v39, %v1983_v1  ;;  %2175 = vmatmul.bf16.vlgmr.msra.gmra.mxu1 %v2017_v14  ;;  %v1918_v8 = vpop.f32.mrf.mxu2  ;;  %v3828_v39 = vld [vmem:[%s5808_s5 + $0x34] sm:$0xf]  ;;  %v2157_v63 = vpop.f32.mrf.mxu0 }
 0x2a1   :  { %v1919_v55 = vadd.f32 %v1918_v8, %v1870_v43  ;;  %v3485_v35 = vor.u32 %v3828_v39, %v3482_v30  ;;  %v3835_v39 = vld [vmem:[%s5808_s5 + $0x64] sm:$0xf0]  ;;  %v3536_v30 = vld [vmem:[%s5808_s5 + $0x68] sm:$0xf0] }
 0x2a2   :  { %v2005_v49 = vadd.f32 %v1997_v47, %v1991_v38  ;;  %v3871_v38 = vld [vmem:[%s5807_s4] ss:$0 sm:$0xff] }
 0x2a3   :  { %v1967_v16 = vpop.f32.mrf.mxu3  ;;  %2252 = vmatpush.bf16.msrb.mxu3 %v3485_v35 }
 0x2a4   :  { %v1968_v25 = vadd.f32 %v1967_v16, %v1919_v55  ;;  %v2013_v32 = vmax.f32 %v2005_v49, 0.0  ;;  %v3836_v49 = vld [vmem:[%s5808_s5 + $0x74] sm:$0xf] }
 0x2a6   :  { %v1985_v15 = vmax.f32 %v1958_v2, %v1968_v25  ;;  %v3542_v25 = vld [vmem:[%s5808_s5 + $0x70] sm:$0xf] }
 0x2a7   :  { %2253 = vmatpush.bf16.msrb.mxu3 %v3477_v44 }
 0x2a8   :  { %v1993_v20 = vmax.f32 %v1977_v58, %v1985_v15  ;;  %v3833_v58 = vld [vmem:[%s5808_s5 + $0x54] sm:$0xf0]  ;;  %v2162_v33 = vpop.f32.mrf.mxu2  ;;  %v2159_v29 = vpop.f32.mrf.mxu0 }
 0x2a9   :  { %v3521_v23 = vor.u32 %v3833_v58, %v3520_v31  ;;  %v3837_v15 = vld [vmem:[%s5808_s5 + $0x74] sm:$0xf0]  ;;  %v3535_v31 = vor.u32 %v3835_v39, %v3534_v36  ;;  %v3539_v58 = vor.u32 %v3834_v21, %v3536_v30 }
 0x2aa   :  { %v2007_v52 = vadd.f32 %v1997_v47, %v1993_v20  ;;  %v3830_v47 = vld [vmem:[%s5808_s5 + $0x44] sm:$0xf]  ;;  %v3544_v20 = vld [vmem:[%s5808_s5 + $0x78] sm:$0xf0] }
 0x2ab   :  { %2343 = vmatpush.bf16.msrb.mxu0 %v3521_v23  ;;  %v3517_v40 = vor.u32 %v3830_v47, %v3514_v56  ;;  %v3547_v26 = vor.u32 %v3836_v49, %v3544_v20  ;;  %v3845_v23 = vld [vmem:[%s5810_s7 + $0x38] sm:$0xff]  ;;  %v3848_v47 = vld [vmem:[%s5810_s7 + $0x50] sm:$0xff] }
 0x2ac   :  { %v2015_v19 = vmax.f32 %v2007_v52, 0.0 }
 0x2ad   :  { %2357 = vmatpush.bf16.msrb.mxu1 %v3517_v40 }
 0x2ae   :  { %v2019_v27 = vpack.c.bf16 %v2015_v19, %v2013_v32 }
 0x2af   :  { %2344 = vmatpush.bf16.msrb.mxu0 %v3513_v3  ;;  %v3840_v3 = vld [vmem:[%s5810_s7 + $0x10] sm:$0xff] }
 0x2b0   :  { %2180 = vmatmul.bf16.vlgmr.msra.gmra.mxu3 %v2019_v27  ;;  %v2164_v17 = vpop.f32.mrf.mxu2  ;;  %v3543_v27 = vor.u32 %v3837_v15, %v3542_v25 }
 0x2b1   :  { %2301 = vmatpush.bf16.msra.mxu3 %v3503_v6  ;;  %2579 = vmatpush.bf16.msra.mxu1 %v3853_v50 }
 0x2b3   :  { %2566 = vmatpush.bf16.msra.mxu0 %v3845_v23 }
 0x2b5   :  { %2302 = vmatpush.bf16.msra.mxu3 %v3495_v22  ;;  %2580 = vmatpush.bf16.msra.mxu1 %v3852_v34  ;;  %v2422_v22 = vld [vmem:[%s5809_s6] sm:$0x3] }
 0x2b7   :  { %2567 = vmatpush.bf16.msra.mxu0 %v3844_v7 }
 0x2b9   :  { %2581 = vmatpush.bf16.msra.mxu1 %v3851_v48 }
 0x2bb   :  { %2568 = vmatpush.bf16.msra.mxu0 %v3843_v5 }
 0x2bd   :  { %2582 = vmatpush.bf16.msra.mxu1 %v3850_v54 }
 0x2bf   :  { %2569 = vmatpush.bf16.msra.mxu0 %v3842_v28 }
 0x2c1   :  { %2583 = vmatpush.bf16.msra.mxu1 %v3849_v10 }
 0x2c3   :  { %2570 = vmatpush.bf16.msra.mxu0 %v3841_v46 }
 0x2c5   :  { %2584 = vmatpush.bf16.msra.mxu1 %v3848_v47 }
 0x2c7   :  { %2571 = vmatpush.bf16.msra.mxu0 %v3840_v3 }
 0x2c9   :  { %2585 = vmatpush.bf16.msra.mxu1 %v3847_v9 }
 0x2cd   :  { %2586 = vmatpush.bf16.msra.mxu1 %v3846_v42 }
 0x31d   :  { %v2176_v57 = vpop.f32.mrf.mxu1 }
 0x31e   :  { %v2177_v12 = vadd.f32 %v2176_v57, %v2157_v63  ;;  %v3839_v57 = vld [vmem:[%s5810_s7 + $0x8] sm:$0xff] }
 0x31f   :  { %2572 = vmatpush.bf16.msra.mxu0 %v3839_v57 }
 0x323   :  { %2573 = vmatpush.bf16.msra.mxu0 %v3838_v41 }
 0x325   :  { %v2178_v18 = vpop.f32.mrf.mxu1 }
 0x326   :  { %v2179_v60 = vadd.f32 %v2178_v18, %v2159_v29  ;;  %v2424_v18 = vperm.slane %v2422_v22, 0 }
 0x328   :  { %v2186_v61 = vmax.f32 %v2177_v12, %v2179_v60  ;;  %v2425_v60 = vperm.slane %v2422_v22, 1 }
 0x333   :  { %v2181_v24 = vpop.f32.mrf.mxu3 }
 0x334   :  { %v2182_v14 = vadd.f32 %v2181_v24, %v2162_v33 }
 0x33b   :  { %v2183_v13 = vpop.f32.mrf.mxu3 }
 0x33c   :  { %v2184_v1 = vadd.f32 %v2183_v13, %v2164_v17 }
 0x33e   :  { %v2187_v62 = vmax.f32 %v2182_v14, %v2184_v1 }
 0x340   :  { %v2188_v43 = vmax.f32 %v2186_v61, %v2187_v62 }
 0x342   :  { %v2193_v8 = vadd.f32 %v3871_v38, %v2188_v43 }
 0x344   :  { %v2194_v55 = vmax.f32 %v2193_v8, 0.0 }
 0x346   :  { %v2195_v16 = vpack.c.bf16 %v2194_v55, %v2194_v55 }
 0x348   :  { %v2206_v2 = vunpack.c.l.b16 %v2195_v16 }
 0x34a   :  { %v2207_v52 = vpack.c.b16 %v2206_v2, %v2206_v2  ;;  %v3872_v2 = vld [vmem:[%s5811_s8] ss:$0 sm:$0xff]  ;;  %s3903_s8 = smov [#allocation2]  }
 0x34b   :  { %s2623_s19 = sshll.u32 %s3903_s8, 4  ;;  %s2624_s19 = int_to_ptr.vmem [resolvable:$true] %s2623_s19 }
 0x34c   :  { %v2208_v32 = vrot.slane %v2207_v52, 1  ;;  %v2313_v19 = vrot.slane %v2207_v52, 2  ;;  %v2370_v35 = vrot.slane %v2207_v52, 3 }
 0x34e   :  { %3486 = vmatmul.msk.bf16.vlgmr.msrb.gmra.mxu2 %vm2229_vm0, %v2208_v32  ;;  %3487 = vmatmul.msk.bf16.vlgmr.msrb.gmra.mxu3 %vm2229_vm0, %v2208_v32 }
 0x34f   :  { %3526 = vmatmul.msk.bf16.vlgmr.msrb.gmra.mxu0 %vm2229_vm0, %v2313_v19  ;;  %3527 = vmatmul.msk.bf16.vlgmr.msrb.gmra.mxu1 %vm2229_vm0, %v2313_v19 }
 0x350   :  { %2400 = vmatpush.bf16.msrb.mxu2 %v3543_v27  ;;  %2413 = vmatpush.bf16.msrb.mxu3 %v3547_v26 }
 0x354   :  { %2401 = vmatpush.bf16.msrb.mxu2 %v3535_v31  ;;  %2414 = vmatpush.bf16.msrb.mxu3 %v3539_v58 }
 0x35e   :  { %3504 = vmatmul.msk.bf16.vlgmr.msra.gmra.mxu2 %vm2229_vm0, %v2195_v16  ;;  %3505 = vmatmul.msk.bf16.vlgmr.msra.gmra.mxu3 %vm2229_vm0, %v2195_v16 }
 0x36e   :  { %3548 = vmatmul.msk.bf16.vlgmr.msrb.gmra.mxu2 %vm2229_vm0, %v2370_v35  ;;  %3549 = vmatmul.msk.bf16.vlgmr.msrb.gmra.mxu3 %vm2229_vm0, %v2370_v35 }
 0x3cc   :  { %v2346_v11 = vpop.f32.mrf.mxu0  ;;  %v2359_v44 = vpop.f32.mrf.mxu1 }
 0x3d1   :  { %v2242_v56 = vpop.f32.mrf.mxu2  ;;  %v2255_v40 = vpop.f32.mrf.mxu3 }
 0x3d4   :  { %v2348_v53 = vpop.f32.mrf.mxu0  ;;  %v2361_v63 = vpop.f32.mrf.mxu1 }
 0x3d9   :  { %v2244_v0 = vpop.f32.mrf.mxu2  ;;  %v2257_v4 = vpop.f32.mrf.mxu3 }
 0x3e1   :  { %v2291_v6 = vpop.f32.mrf.mxu2  ;;  %v2304_v59 = vpop.f32.mrf.mxu3 }
 0x3e2   :  { %v2292_v33 = vadd.f32 %v2291_v6, %v2242_v56  ;;  %v2305_v37 = vadd.f32 %v2304_v59, %v2255_v40 }
 0x3e4   :  { %v2363_v24 = vadd.f32 %v2346_v11, %v2292_v33  ;;  %v2364_v29 = vadd.f32 %v2359_v44, %v2305_v37 }
 0x3e9   :  { %v2293_v45 = vpop.f32.mrf.mxu2  ;;  %v2306_v51 = vpop.f32.mrf.mxu3 }
 0x3f1   :  { %v2403_v17 = vpop.f32.mrf.mxu2  ;;  %v2416_v13 = vpop.f32.mrf.mxu3 }
 0x3f2   :  { %v2420_v12 = vadd.f32 %v2403_v17, %v2363_v24  ;;  %v2421_v14 = vadd.f32 %v2416_v13, %v2364_v29 }
 0x3f4   :  { %v2428_v1 = vadd.f32 %v2424_v18, %v2420_v12  ;;  %v2429_v61 = vadd.f32 %v2425_v60, %v2421_v14 }
 0x3f6   :  { %v2430_v62 = vmax.f32 %v2428_v1, 0.0  ;;  %v2431_v38 = vmax.f32 %v2429_v61, 0.0 }
 0x3f8   :  { %v2432_v43 = vpack.c.bf16 %v2430_v62, %v2430_v62  ;;  %v2433_v8 = vpack.c.bf16 %v2431_v38, %v2431_v38 }
 0x3f9   :  { %v2405_v55 = vpop.f32.mrf.mxu2  ;;  %v2418_v16 = vpop.f32.mrf.mxu3 }
 0x3fa   :  { %2574 = vmatmul.bf16.vlgmr.msra.gmra.mxu0 %v2432_v43  ;;  %2587 = vmatmul.bf16.vlgmr.msra.gmra.mxu1 %v2433_v8 }
 0x477   :  { %v2575_v25 = vpop.f32.mrf.mxu0  ;;  %v2588_v15 = vpop.f32.mrf.mxu1 }
 0x478   :  { %v2576_v49 = vadd.f32 %v3872_v2, %v2575_v25 }
 0x47a   :  { %v2589_v20 = vadd.f32 %v2588_v15, %v2576_v49 }
 0x47c   :  { %v2593_v52 = vsel %vm2592_vm1, %v2589_v20, -inf }
 0x47d   :  { %2594 = vmax.xlane.f32.xlu0 %v2593_v52 }
 0x47f   :  { %v2577_v32 = vpop.f32.mrf.mxu0  ;;  %v2590_v19 = vpop.f32.mrf.mxu1 }
 0x4f0   :  { %v2595_v27 = vpop.xlane.xlu0 %2594 }
 0x4f1   :  { %v2596_v26 = vsub.f32 %v2589_v20, %v2595_v27 }
 0x4f3   :  { %v2597_v36 = vmul.f32 1.442695, %v2596_v26 }
 0x4f5   :  { %3873 = vpow2.f32 %v2597_v36 }
 0x4fb   :  { %v3874_v39 = vpop.eup %3873 }
 0x4fc   :  { %v2599_v21 = vsel %vm2592_vm1, %v3874_v39, 0.0 }
 0x4fd   :  { %2600 = vadd.xlane.f32.xlu0 %v2599_v21 }
 0x570   :  { %v2601_v30 = vpop.xlane.xlu0 %2600 }
 0x571   :  { %3875 = vrcp.f32 %v2601_v30  ;;  %v2613_v23 = vand.u32 2147483648, %v2601_v30  ;;  %v2611_v7 = vand.u32 2147483647, %v2601_v30  ;;  %vm2607_vm3 = vweird.f32 %v2601_v30 }
 0x573   :  { %v2614_v5 = vor.u32 1.1754944e-38, %v2613_v23  ;;  %vm2612_vm5 = vcmp.eq.f32.partialorder %v2611_v7, 8.507059e+37 }
 0x577   :  { %v3876_v31 = vpop.eup %3875 }
 0x578   :  { %v2603_v58 = vmul.f32 %v3876_v31, %v2601_v30  ;;  %vm2608_vm2 = vweird.f32 %v3876_v31 }
 0x579   :  { %vm2609_vm4 = vmor %vm2607_vm3, %vm2608_vm2 }
 0x57a   :  { %v2604_v35 = vsub.f32 1.0, %v2603_v58 }
 0x57c   :  { %v2605_v50 = vmul.f32 %v3876_v31, %v2604_v35 }
 0x57e   :  { %v2606_v34 = vadd.f32 %v3876_v31, %v2605_v50 }
 0x580   :  { %v2610_v48 = vsel %vm2609_vm4, %v3876_v31, %v2606_v34 }
 0x581   :  { %v2615_v28 = vsel %vm2612_vm5, %v2614_v5, %v2610_v48 }
 0x582   :  { %v2616_v54 = vmul.f32 %v3874_v39, %v2615_v28 }
 0x584   :  { %2617 = vst.msk [vmem:[#allocation2] sm:$0x3] %vm2592_vm1, %v2616_v54 }
 0x585   :  { %2628 = dma.vmem_to_hbm [thread:$0]  %s2624_s19, 32, %s2626_s22, [#allocation3]  }
 0x586   :  { %3901 = dma.done.wait [#allocation3], 32  }
 0x587   :  { %3902 = vsyncadd [#allocation3], 4294967264 }
 0x588   :  { %2633 = vsyncpa [#allocation3], 1 }

</bundles_post_ra>
